<compile_context>
chip_gen: v7x
topology: tpu7x:2x2x1
jax: 0.10.0
libtpu: 0.0.40
codegen_flags: <defaults>
</compile_context>

<pallas_src>
import functools

import numpy as np

import jax
import jax.numpy as jnp
from jax.experimental import pallas as pl
from jax.experimental.pallas import tpu as pltpu

VMEM = pltpu.MemorySpace.VMEM
GEMM_DTYPE = jnp.bfloat16  # MXU operand dtype (f32 accumulation everywhere)


def _round_up(v, m):
    return (v + m - 1) // m * m


# ---------------------------------------------------------------------------
# The single fused Pallas kernel
# ---------------------------------------------------------------------------

def _fused_resnet_kernel(pA, w_stem, b_stem, g1, w1, b1, g2, w2, gsc, wsc,
                         b_res, pool, fcw, fcb, o_ref, *, mq, taps):
    """Whole forward pass after the stem im2col, entirely in VMEM/registers.

    pA     : (4*mq, Kpad) stem im2col rows, pre-arranged so the 4 max-pool
             mates form 4 contiguous row blocks of `mq` rows each.
    g1/g2  : (taps, m_out, m_in) 0/1 row-gather matrices realizing the 3x3
             im2col of the residual block (split-K; one small dot per tap).
    gsc    : (m_out, mq) gather for the 1x1 stride-2 shortcut taps.
    w2/wsc : BN-folded conv2 / shortcut weights; b_res = summed BN shifts.
    pool   : (N, m_out) adaptive-avg-pool matrix.
    fcw/fcb: fc->fc1->fc2 pre-folded into one (64, num_classes_padded) GEMM.
    """
    f32 = jnp.float32

    # ---- Stem: conv1(5x5,s2) GEMM + bias + ReLU + 2x2 max-pool -------------
    acc = jnp.dot(pA[...], w_stem[...], preferred_element_type=f32)
    acc = jnp.maximum(acc + b_stem[...], 0.0)
    x1 = jnp.maximum(jnp.maximum(acc[0 * mq:1 * mq], acc[1 * mq:2 * mq]),
                     jnp.maximum(acc[2 * mq:3 * mq], acc[3 * mq:4 * mq]))
    x1 = x1.astype(GEMM_DTYPE)                       # (mq, 32), stays on-chip

    # ---- Residual block conv1: 3x3 s2 p1 + bias + ReLU ---------------------
    # TODO(synk): nn.Dropout(p=0.3) after this ReLU is identity (eval mode).
    m2 = g1.shape[1]
    c1 = jnp.zeros((m2, w1.shape[2]), f32)
    for t in range(taps):
        gx = jnp.dot(g1[t], x1, preferred_element_type=f32)
        c1 = c1 + jnp.dot(gx.astype(GEMM_DTYPE), w1[t],
                          preferred_element_type=f32)
    y1 = jnp.maximum(c1 + b1[...], 0.0).astype(GEMM_DTYPE)        # (m2, 64)

    # ---- conv2+BN2 and 1x1 shortcut+BN (split-K), add + ReLU ---------------
    c2 = jnp.zeros((m2, w2.shape[2]), f32)
    for t in range(taps):
        gy = jnp.dot(g2[t], y1, preferred_element_type=f32)
        c2 = c2 + jnp.dot(gy.astype(GEMM_DTYPE), w2[t],
                          preferred_element_type=f32)
    sx = jnp.dot(gsc[...], x1, preferred_element_type=f32)
    c2 = c2 + jnp.dot(sx.astype(GEMM_DTYPE), wsc[...],
                      preferred_element_type=f32)
    res = jnp.maximum(c2 + b_res[...], 0.0)                       # (m2, 64)

    # ---- AdaptiveAvgPool(1,1) + folded fc->fc1->fc2 (lane-dense store) -----
    feat = jnp.dot(pool[...], res, preferred_element_type=f32)    # (N, 64)
    o_ref[...] = jnp.dot(feat, fcw[...], preferred_element_type=f32) + fcb[...]


# ---------------------------------------------------------------------------
# Plain-JAX glue: stem im2col + K-padding of activations (input path only)
# ---------------------------------------------------------------------------

def _im2col(x, kh, kw, stride, pad):
    """NHWC -> (N, Hout, Wout, kh*kw*C) patches, (kh, kw, cin) column order."""
    N, H, W, C = x.shape
    xp = jnp.pad(x, ((0, 0), (pad, pad), (pad, pad), (0, 0)))
    Hout = (H + 2 * pad - kh) // stride + 1
    Wout = (W + 2 * pad - kw) // stride + 1
    cols = [xp[:, i:i + Hout * stride:stride, j:j + Wout * stride:stride, :]
            for i in range(kh) for j in range(kw)]
    return jnp.concatenate(cols, axis=-1), Hout, Wout


def _pad_cols(a, k_target):
    k = a.shape[-1]
    if k == k_target:
        return a
    return jnp.pad(a, ((0, 0), (0, k_target - k)))


# ---------------------------------------------------------------------------
# Static geometry: per-tap 0/1 row-gather matrices (numpy, computed once)
# ---------------------------------------------------------------------------

def _conv_gather(n, h_in, w_in, h_out, w_out, k, stride, pad):
    """(k*k, n*h_out*w_out, n*h_in*w_in) selection matrices; zero rows = padding."""
    m_out, m_in = n * h_out * w_out, n * h_in * w_in
    g = np.zeros((k * k, m_out, m_in), np.float32)
    for dh in range(k):
        for dw in range(k):
            t = dh * k + dw
            for b in range(n):
                for ho in range(h_out):
                    for wo in range(w_out):
                        hi = ho * stride + dh - pad
                        wi = wo * stride + dw - pad
                        if 0 <= hi < h_in and 0 <= wi < w_in:
                            g[t,
                              b * h_out * w_out + ho * w_out + wo,
                              b * h_in * w_in + hi * w_in + wi] = 1.0
    return g


# ---------------------------------------------------------------------------
# One-time parameter preparation (transposes / BN folds / fc folds / pads)
# ---------------------------------------------------------------------------

def _bn_fold(gamma, beta, mean, var, eps=1e-5):
    scale = gamma / jnp.sqrt(var + eps)
    shift = beta - mean * scale
    return scale, shift


def prepare_params(params, batch, image_hw=(16, 16), num_classes=2,
                   gemm_dtype=GEMM_DTYPE):
    H, W = image_hw
    Ho, Wo = (H + 4 - 5) // 2 + 1, (W + 4 - 5) // 2 + 1       # stem conv out
    if Ho % 2 or Wo % 2:
        raise ValueError("maxpool2x2 requires even conv1 output spatial dims")
    Hp, Wp = Ho // 2, Wo // 2                                  # after max-pool
    H2, W2 = (Hp + 2 - 3) // 2 + 1, (Wp + 2 - 3) // 2 + 1      # block conv1 out

    def conv_mat(w_oihw):
        co, ci, kh, kw = w_oihw.shape
        return jnp.transpose(w_oihw, (2, 3, 1, 0)).reshape(kh * kw * ci, co)

    b = params["block"]
    s2, sh2 = _bn_fold(b["bn2_g"], b["bn2_b"], b["bn2_m"], b["bn2_v"])
    ssc, shsc = _bn_fold(b["scbn_g"], b["scbn_b"], b["scbn_m"], b["scbn_v"])

    # Stem conv weights (K padded to a 128 multiple -> lane-aligned GEMM).
    stem_w = conv_mat(params["conv1_w"])
    kp = _round_up(stem_w.shape[0], 128)
    stem_w = jnp.pad(stem_w, ((0, kp - stem_w.shape[0]), (0, 0))).astype(gemm_dtype)

    # Residual-block weights in per-tap (taps, cin, cout) layout, BN folded.
    co1, ci1, kh1, kw1 = b["c1_w"].shape
    c1_w = conv_mat(b["c1_w"]).reshape(kh1 * kw1, ci1, co1).astype(gemm_dtype)
    co2, ci2, kh2, kw2 = b["c2_w"].shape
    c2_w = (conv_mat(b["c2_w"]) * s2[None, :]
            ).reshape(kh2 * kw2, ci2, co2).astype(gemm_dtype)
    sc_w = (conv_mat(b["sc_w"]) * ssc[None, :]).astype(gemm_dtype)   # (32, 64)

    # fc -> fc1 -> fc2 folded into one GEMM (no nonlinearity between them).
    wf = params["fc2_w"] @ params["fc1_w"] @ params["fc_w"]          # (nc, 64)
    bf = (params["fc2_w"] @ (params["fc1_w"] @ params["fc_b"] + params["fc1_b"])
          + params["fc2_b"])
    ncp = _round_up(num_classes, 128)                                # lane-dense store
    fc_w = jnp.pad(wf.T, ((0, 0), (0, ncp - num_classes))).astype(jnp.float32)
    fc_b = jnp.pad(bf, (0, ncp - num_classes)).reshape(1, ncp).astype(jnp.float32)

    # Static geometry: gather matrices for in-kernel im2col + avg-pool matrix.
    g1 = _conv_gather(batch, Hp, Wp, H2, W2, 3, 2, 1)
    g2 = _conv_gather(batch, H2, W2, H2, W2, 3, 1, 1)
    gsc = _conv_gather(batch, Hp, Wp, H2, W2, 1, 2, 0)[0]
    pool = np.kron(np.eye(batch, dtype=np.float32),
                   np.full((1, H2 * W2), 1.0 / (H2 * W2), np.float32))

    return {
        "stem_w": stem_w,
        "stem_b": params["conv1_b"].reshape(1, -1).astype(jnp.float32),
        "bc1_w": c1_w,
        "bc1_b": b["c1_b"].reshape(1, -1).astype(jnp.float32),
        "c2_w": c2_w,
        "sc_w": sc_w,
        "res_b": (sh2 + shsc).reshape(1, -1).astype(jnp.float32),
        "g1": jnp.asarray(g1, gemm_dtype),
        "g2": jnp.asarray(g2, gemm_dtype),
        "gsc": jnp.asarray(gsc, gemm_dtype),
        "pool": jnp.asarray(pool, jnp.float32),
        "fc_w": fc_w,
        "fc_b": fc_b,
        "num_classes": num_classes,
        "batch": batch,
        "stem_hw": (Hp, Wp),
    }


# ---------------------------------------------------------------------------
# Forward pass (ONE Pallas kernel)
# ---------------------------------------------------------------------------

def resnet18_forward(x_nchw, prep):
    x = jnp.transpose(x_nchw, (0, 2, 3, 1)).astype(jnp.float32)   # NCHW -> NHWC
    N = x.shape[0]
    if N != prep["batch"]:
        raise ValueError("batch size must match prepare_params(batch=...)")

    # Stem im2col on the raw input (must be read from HBM anyway), with rows
    # pre-arranged into 4 pool-offset blocks so the kernel's max-pool is a max
    # of 4 static sublane slices.
    patches, Ho, Wo = _im2col(x, 5, 5, 2, 2)
    Hp, Wp = Ho // 2, Wo // 2
    if (Hp, Wp) != prep["stem_hw"]:
        raise ValueError("input spatial size must match prepare_params(image_hw=...)")
    K = patches.shape[-1]
    mq = N * Hp * Wp
    p = patches.reshape(N, Hp, 2, Wp, 2, K).transpose(2, 4, 0, 1, 3, 5)
    p = p.reshape(4 * mq, K)
    p = _pad_cols(p, prep["stem_w"].shape[0]).astype(GEMM_DTYPE)

    out = pl.pallas_call(
        functools.partial(_fused_resnet_kernel,
                          mq=mq, taps=prep["g1"].shape[0]),
        out_shape=jax.ShapeDtypeStruct((N, prep["fc_w"].shape[1]), jnp.float32),
        in_specs=[pl.BlockSpec(memory_space=VMEM)] * 14,
        out_specs=pl.BlockSpec(memory_space=VMEM),
    )(p, prep["stem_w"], prep["stem_b"],
      prep["g1"], prep["bc1_w"], prep["bc1_b"],
      prep["g2"], prep["c2_w"], prep["gsc"], prep["sc_w"], prep["res_b"],
      prep["pool"], prep["fc_w"], prep["fc_b"])
    return out[:, :prep["num_classes"]]


# ---------------------------------------------------------------------------
# Deterministic parameter construction (PyTorch layouts: OIHW conv, (out,in) fc)
# ---------------------------------------------------------------------------

def init_params(key, num_classes=2):
    ks = iter(jax.random.split(key, 32))

    def w(shape, fan_in):
        return (jax.random.normal(next(ks), shape, jnp.float32)
                / jnp.sqrt(jnp.float32(fan_in)))

    def bn(c):
        return dict(
            g=1.0 + 0.1 * jax.random.normal(next(ks), (c,), jnp.float32),
            b=0.1 * jax.random.normal(next(ks), (c,), jnp.float32),
            m=0.1 * jax.random.normal(next(ks), (c,), jnp.float32),
            v=1.0 + 0.5 * jax.random.uniform(next(ks), (c,), jnp.float32),
        )

    bn2, scbn = bn(64), bn(64)
    return {
        "conv1_w": w((32, 3, 5, 5), 3 * 5 * 5),
        "conv1_b": 0.05 * jax.random.normal(next(ks), (32,), jnp.float32),
        "block": {
            "c1_w": w((64, 32, 3, 3), 32 * 3 * 3),
            "c1_b": 0.05 * jax.random.normal(next(ks), (64,), jnp.float32),
            "c2_w": w((64, 64, 3, 3), 64 * 3 * 3),
            "bn2_g": bn2["g"], "bn2_b": bn2["b"], "bn2_m": bn2["m"], "bn2_v": bn2["v"],
            "sc_w": w((64, 32, 1, 1), 32),
            "scbn_g": scbn["g"], "scbn_b": scbn["b"], "scbn_m": scbn["m"], "scbn_v": scbn["v"],
        },
        "fc_w": w((48, 64), 64),
        "fc_b": 0.05 * jax.random.normal(next(ks), (48,), jnp.float32),
        "fc1_w": w((24, 48), 48),
        "fc1_b": 0.05 * jax.random.normal(next(ks), (24,), jnp.float32),
        "fc2_w": w((num_classes, 24), 24),
        "fc2_b": 0.05 * jax.random.normal(next(ks), (num_classes,), jnp.float32),
    }


if __name__ == "__main__":
    key = jax.random.PRNGKey(0)
    k_x, k_p = jax.random.split(key)
    # Input follows PyTorch NCHW: batch=2, channels=3, spatial=16x16.
    x = jax.random.normal(k_x, (2, 3, 16, 16), jnp.float32)
    params = init_params(k_p, num_classes=2)
    prep = prepare_params(params, batch=2, image_hw=(16, 16), num_classes=2)

    fwd = jax.jit(lambda xx: resnet18_forward(xx, prep))
    out = jax.block_until_ready(fwd(x))
    assert out.shape == (2, 2), out.shape
    assert bool(jnp.all(jnp.isfinite(out)))
    print("KERNEL_OK")
</pallas_src>

<mosaic_0001>
module attributes {stable_mosaic.version = 11 : i64} {
  func.func @_fused_resnet_kernel(%arg0: memref<128x128xbf16, #tpu.memory_space<vmem>>, %arg1: memref<128x32xbf16, #tpu.memory_space<vmem>>, %arg2: memref<1x32xf32, #tpu.memory_space<vmem>>, %arg3: memref<9x8x32xbf16, #tpu.memory_space<vmem>>, %arg4: memref<9x32x64xbf16, #tpu.memory_space<vmem>>, %arg5: memref<1x64xf32, #tpu.memory_space<vmem>>, %arg6: memref<9x8x8xbf16, #tpu.memory_space<vmem>>, %arg7: memref<9x64x64xbf16, #tpu.memory_space<vmem>>, %arg8: memref<8x32xbf16, #tpu.memory_space<vmem>>, %arg9: memref<32x64xbf16, #tpu.memory_space<vmem>>, %arg10: memref<1x64xf32, #tpu.memory_space<vmem>>, %arg11: memref<2x8xf32, #tpu.memory_space<vmem>>, %arg12: memref<64x128xf32, #tpu.memory_space<vmem>>, %arg13: memref<1x128xf32, #tpu.memory_space<vmem>>, %arg14: memref<2x128xf32, #tpu.memory_space<vmem>>) attributes {dimension_semantics = [], scalar_prefetch = 0 : i64, scratch_operands = 0 : i64, tpu.core_type = #tpu.core_type<tc>} {
    %c0 = arith.constant 0 : index
    %c0_0 = arith.constant 0 : index
    %0 = vector.load %arg0[%c0, %c0_0] : memref<128x128xbf16, #tpu.memory_space<vmem>>, vector<128x128xbf16>
    %c0_1 = arith.constant 0 : index
    %c0_2 = arith.constant 0 : index
    %1 = vector.load %arg1[%c0_1, %c0_2] : memref<128x32xbf16, #tpu.memory_space<vmem>>, vector<128x32xbf16>
    %cst = arith.constant dense<0.000000e+00> : vector<128x32xf32>
    %2 = tpu.matmul %0, %1, %cst {dimension_numbers = #tpu.dot_dimension_numbers<[1], [0], [0], [1], [0, 0, 1, 1], [], []>} : vector<128x128xbf16>, vector<128x32xbf16>, vector<128x32xf32> -> vector<128x32xf32>
    %c0_3 = arith.constant 0 : index
    %c0_4 = arith.constant 0 : index
    %3 = vector.load %arg2[%c0_3, %c0_4] : memref<1x32xf32, #tpu.memory_space<vmem>>, vector<1x32xf32>
    %4 = vector.broadcast %3 : vector<1x32xf32> to vector<128x32xf32>
    %5 = arith.addf %2, %4 : vector<128x32xf32>
    %cst_5 = arith.constant 0.000000e+00 : f32
    %6 = vector.broadcast %cst_5 : f32 to vector<128x32xf32>
    %7 = arith.maximumf %5, %6 : vector<128x32xf32>
    %8 = vector.extract_strided_slice %7 {offsets = [0, 0], sizes = [32, 32], strides = [1, 1]} : vector<128x32xf32> to vector<32x32xf32>
    %9 = vector.extract_strided_slice %7 {offsets = [32, 0], sizes = [32, 32], strides = [1, 1]} : vector<128x32xf32> to vector<32x32xf32>
    %10 = arith.maximumf %8, %9 : vector<32x32xf32>
    %11 = vector.extract_strided_slice %7 {offsets = [64, 0], sizes = [32, 32], strides = [1, 1]} : vector<128x32xf32> to vector<32x32xf32>
    %12 = vector.extract_strided_slice %7 {offsets = [96, 0], sizes = [32, 32], strides = [1, 1]} : vector<128x32xf32> to vector<32x32xf32>
    %13 = arith.maximumf %11, %12 : vector<32x32xf32>
    %14 = arith.maximumf %10, %13 : vector<32x32xf32>
    %15 = arith.truncf %14 : vector<32x32xf32> to vector<32x32xbf16>
    %cst_6 = arith.constant 0.000000e+00 : f32
    %16 = vector.broadcast %cst_6 : f32 to vector<8x64xf32>
    %c0_7 = arith.constant 0 : index
    %c0_8 = arith.constant 0 : index
    %c0_9 = arith.constant 0 : index
    %17 = vector.load %arg3[%c0_7, %c0_8, %c0_9] : memref<9x8x32xbf16, #tpu.memory_space<vmem>>, vector<1x8x32xbf16>
    %18 = vector.shape_cast %17 : vector<1x8x32xbf16> to vector<8x32xbf16>
    %cst_10 = arith.constant dense<0.000000e+00> : vector<8x32xf32>
    %19 = tpu.matmul %18, %15, %cst_10 {dimension_numbers = #tpu.dot_dimension_numbers<[1], [0], [0], [1], [0, 0, 1, 1], [], []>} : vector<8x32xbf16>, vector<32x32xbf16>, vector<8x32xf32> -> vector<8x32xf32>
    %20 = arith.truncf %19 : vector<8x32xf32> to vector<8x32xbf16>
    %c0_11 = arith.constant 0 : index
    %c0_12 = arith.constant 0 : index
    %c0_13 = arith.constant 0 : index
    %21 = vector.load %arg4[%c0_11, %c0_12, %c0_13] : memref<9x32x64xbf16, #tpu.memory_space<vmem>>, vector<1x32x64xbf16>
    %22 = vector.shape_cast %21 : vector<1x32x64xbf16> to vector<32x64xbf16>
    %cst_14 = arith.constant dense<0.000000e+00> : vector<8x64xf32>
    %23 = tpu.matmul %20, %22, %cst_14 {dimension_numbers = #tpu.dot_dimension_numbers<[1], [0], [0], [1], [0, 0, 1, 1], [], []>} : vector<8x32xbf16>, vector<32x64xbf16>, vector<8x64xf32> -> vector<8x64xf32>
    %24 = arith.addf %16, %23 : vector<8x64xf32>
    %c1 = arith.constant 1 : index
    %c0_15 = arith.constant 0 : index
    %c0_16 = arith.constant 0 : index
    %25 = vector.load %arg3[%c1, %c0_15, %c0_16] : memref<9x8x32xbf16, #tpu.memory_space<vmem>>, vector<1x8x32xbf16>
    %26 = vector.shape_cast %25 : vector<1x8x32xbf16> to vector<8x32xbf16>
    %cst_17 = arith.constant dense<0.000000e+00> : vector<8x32xf32>
    %27 = tpu.matmul %26, %15, %cst_17 {dimension_numbers = #tpu.dot_dimension_numbers<[1], [0], [0], [1], [0, 0, 1, 1], [], []>} : vector<8x32xbf16>, vector<32x32xbf16>, vector<8x32xf32> -> vector<8x32xf32>
    %28 = arith.truncf %27 : vector<8x32xf32> to vector<8x32xbf16>
    %c1_18 = arith.constant 1 : index
    %c0_19 = arith.constant 0 : index
    %c0_20 = arith.constant 0 : index
    %29 = vector.load %arg4[%c1_18, %c0_19, %c0_20] : memref<9x32x64xbf16, #tpu.memory_space<vmem>>, vector<1x32x64xbf16>
    %30 = vector.shape_cast %29 : vector<1x32x64xbf16> to vector<32x64xbf16>
    %cst_21 = arith.constant dense<0.000000e+00> : vector<8x64xf32>
    %31 = tpu.matmul %28, %30, %cst_21 {dimension_numbers = #tpu.dot_dimension_numbers<[1], [0], [0], [1], [0, 0, 1, 1], [], []>} : vector<8x32xbf16>, vector<32x64xbf16>, vector<8x64xf32> -> vector<8x64xf32>
    %32 = arith.addf %24, %31 : vector<8x64xf32>
    %c2 = arith.constant 2 : index
    %c0_22 = arith.constant 0 : index
    %c0_23 = arith.constant 0 : index
    %33 = vector.load %arg3[%c2, %c0_22, %c0_23] : memref<9x8x32xbf16, #tpu.memory_space<vmem>>, vector<1x8x32xbf16>
    %34 = vector.shape_cast %33 : vector<1x8x32xbf16> to vector<8x32xbf16>
    %cst_24 = arith.constant dense<0.000000e+00> : vector<8x32xf32>
    %35 = tpu.matmul %34, %15, %cst_24 {dimension_numbers = #tpu.dot_dimension_numbers<[1], [0], [0], [1], [0, 0, 1, 1], [], []>} : vector<8x32xbf16>, vector<32x32xbf16>, vector<8x32xf32> -> vector<8x32xf32>
    %36 = arith.truncf %35 : vector<8x32xf32> to vector<8x32xbf16>
    %c2_25 = arith.constant 2 : index
    %c0_26 = arith.constant 0 : index
    %c0_27 = arith.constant 0 : index
    %37 = vector.load %arg4[%c2_25, %c0_26, %c0_27] : memref<9x32x64xbf16, #tpu.memory_space<vmem>>, vector<1x32x64xbf16>
    %38 = vector.shape_cast %37 : vector<1x32x64xbf16> to vector<32x64xbf16>
    %cst_28 = arith.constant dense<0.000000e+00> : vector<8x64xf32>
    %39 = tpu.matmul %36, %38, %cst_28 {dimension_numbers = #tpu.dot_dimension_numbers<[1], [0], [0], [1], [0, 0, 1, 1], [], []>} : vector<8x32xbf16>, vector<32x64xbf16>, vector<8x64xf32> -> vector<8x64xf32>
    %40 = arith.addf %32, %39 : vector<8x64xf32>
    %c3 = arith.constant 3 : index
    %c0_29 = arith.constant 0 : index
    %c0_30 = arith.constant 0 : index
    %41 = vector.load %arg3[%c3, %c0_29, %c0_30] : memref<9x8x32xbf16, #tpu.memory_space<vmem>>, vector<1x8x32xbf16>
    %42 = vector.shape_cast %41 : vector<1x8x32xbf16> to vector<8x32xbf16>
    %cst_31 = arith.constant dense<0.000000e+00> : vector<8x32xf32>
    %43 = tpu.matmul %42, %15, %cst_31 {dimension_numbers = #tpu.dot_dimension_numbers<[1], [0], [0], [1], [0, 0, 1, 1], [], []>} : vector<8x32xbf16>, vector<32x32xbf16>, vector<8x32xf32> -> vector<8x32xf32>
    %44 = arith.truncf %43 : vector<8x32xf32> to vector<8x32xbf16>
    %c3_32 = arith.constant 3 : index
    %c0_33 = arith.constant 0 : index
    %c0_34 = arith.constant 0 : index
    %45 = vector.load %arg4[%c3_32, %c0_33, %c0_34] : memref<9x32x64xbf16, #tpu.memory_space<vmem>>, vector<1x32x64xbf16>
    %46 = vector.shape_cast %45 : vector<1x32x64xbf16> to vector<32x64xbf16>
    %cst_35 = arith.constant dense<0.000000e+00> : vector<8x64xf32>
    %47 = tpu.matmul %44, %46, %cst_35 {dimension_numbers = #tpu.dot_dimension_numbers<[1], [0], [0], [1], [0, 0, 1, 1], [], []>} : vector<8x32xbf16>, vector<32x64xbf16>, vector<8x64xf32> -> vector<8x64xf32>
    %48 = arith.addf %40, %47 : vector<8x64xf32>
    %c4 = arith.constant 4 : index
    %c0_36 = arith.constant 0 : index
    %c0_37 = arith.constant 0 : index
    %49 = vector.load %arg3[%c4, %c0_36, %c0_37] : memref<9x8x32xbf16, #tpu.memory_space<vmem>>, vector<1x8x32xbf16>
    %50 = vector.shape_cast %49 : vector<1x8x32xbf16> to vector<8x32xbf16>
    %cst_38 = arith.constant dense<0.000000e+00> : vector<8x32xf32>
    %51 = tpu.matmul %50, %15, %cst_38 {dimension_numbers = #tpu.dot_dimension_numbers<[1], [0], [0], [1], [0, 0, 1, 1], [], []>} : vector<8x32xbf16>, vector<32x32xbf16>, vector<8x32xf32> -> vector<8x32xf32>
    %52 = arith.truncf %51 : vector<8x32xf32> to vector<8x32xbf16>
    %c4_39 = arith.constant 4 : index
    %c0_40 = arith.constant 0 : index
    %c0_41 = arith.constant 0 : index
    %53 = vector.load %arg4[%c4_39, %c0_40, %c0_41] : memref<9x32x64xbf16, #tpu.memory_space<vmem>>, vector<1x32x64xbf16>
    %54 = vector.shape_cast %53 : vector<1x32x64xbf16> to vector<32x64xbf16>
    %cst_42 = arith.constant dense<0.000000e+00> : vector<8x64xf32>
    %55 = tpu.matmul %52, %54, %cst_42 {dimension_numbers = #tpu.dot_dimension_numbers<[1], [0], [0], [1], [0, 0, 1, 1], [], []>} : vector<8x32xbf16>, vector<32x64xbf16>, vector<8x64xf32> -> vector<8x64xf32>
    %56 = arith.addf %48, %55 : vector<8x64xf32>
    %c5 = arith.constant 5 : index
    %c0_43 = arith.constant 0 : index
    %c0_44 = arith.constant 0 : index
    %57 = vector.load %arg3[%c5, %c0_43, %c0_44] : memref<9x8x32xbf16, #tpu.memory_space<vmem>>, vector<1x8x32xbf16>
    %58 = vector.shape_cast %57 : vector<1x8x32xbf16> to vector<8x32xbf16>
    %cst_45 = arith.constant dense<0.000000e+00> : vector<8x32xf32>
    %59 = tpu.matmul %58, %15, %cst_45 {dimension_numbers = #tpu.dot_dimension_numbers<[1], [0], [0], [1], [0, 0, 1, 1], [], []>} : vector<8x32xbf16>, vector<32x32xbf16>, vector<8x32xf32> -> vector<8x32xf32>
    %60 = arith.truncf %59 : vector<8x32xf32> to vector<8x32xbf16>
    %c5_46 = arith.constant 5 : index
    %c0_47 = arith.constant 0 : index
    %c0_48 = arith.constant 0 : index
    %61 = vector.load %arg4[%c5_46, %c0_47, %c0_48] : memref<9x32x64xbf16, #tpu.memory_space<vmem>>, vector<1x32x64xbf16>
    %62 = vector.shape_cast %61 : vector<1x32x64xbf16> to vector<32x64xbf16>
    %cst_49 = arith.constant dense<0.000000e+00> : vector<8x64xf32>
    %63 = tpu.matmul %60, %62, %cst_49 {dimension_numbers = #tpu.dot_dimension_numbers<[1], [0], [0], [1], [0, 0, 1, 1], [], []>} : vector<8x32xbf16>, vector<32x64xbf16>, vector<8x64xf32> -> vector<8x64xf32>
    %64 = arith.addf %56, %63 : vector<8x64xf32>
    %c6 = arith.constant 6 : index
    %c0_50 = arith.constant 0 : index
    %c0_51 = arith.constant 0 : index
    %65 = vector.load %arg3[%c6, %c0_50, %c0_51] : memref<9x8x32xbf16, #tpu.memory_space<vmem>>, vector<1x8x32xbf16>
    %66 = vector.shape_cast %65 : vector<1x8x32xbf16> to vector<8x32xbf16>
    %cst_52 = arith.constant dense<0.000000e+00> : vector<8x32xf32>
    %67 = tpu.matmul %66, %15, %cst_52 {dimension_numbers = #tpu.dot_dimension_numbers<[1], [0], [0], [1], [0, 0, 1, 1], [], []>} : vector<8x32xbf16>, vector<32x32xbf16>, vector<8x32xf32> -> vector<8x32xf32>
    %68 = arith.truncf %67 : vector<8x32xf32> to vector<8x32xbf16>
    %c6_53 = arith.constant 6 : index
    %c0_54 = arith.constant 0 : index
    %c0_55 = arith.constant 0 : index
    %69 = vector.load %arg4[%c6_53, %c0_54, %c0_55] : memref<9x32x64xbf16, #tpu.memory_space<vmem>>, vector<1x32x64xbf16>
    %70 = vector.shape_cast %69 : vector<1x32x64xbf16> to vector<32x64xbf16>
    %cst_56 = arith.constant dense<0.000000e+00> : vector<8x64xf32>
    %71 = tpu.matmul %68, %70, %cst_56 {dimension_numbers = #tpu.dot_dimension_numbers<[1], [0], [0], [1], [0, 0, 1, 1], [], []>} : vector<8x32xbf16>, vector<32x64xbf16>, vector<8x64xf32> -> vector<8x64xf32>
    %72 = arith.addf %64, %71 : vector<8x64xf32>
    %c7 = arith.constant 7 : index
    %c0_57 = arith.constant 0 : index
    %c0_58 = arith.constant 0 : index
    %73 = vector.load %arg3[%c7, %c0_57, %c0_58] : memref<9x8x32xbf16, #tpu.memory_space<vmem>>, vector<1x8x32xbf16>
    %74 = vector.shape_cast %73 : vector<1x8x32xbf16> to vector<8x32xbf16>
    %cst_59 = arith.constant dense<0.000000e+00> : vector<8x32xf32>
    %75 = tpu.matmul %74, %15, %cst_59 {dimension_numbers = #tpu.dot_dimension_numbers<[1], [0], [0], [1], [0, 0, 1, 1], [], []>} : vector<8x32xbf16>, vector<32x32xbf16>, vector<8x32xf32> -> vector<8x32xf32>
    %76 = arith.truncf %75 : vector<8x32xf32> to vector<8x32xbf16>
    %c7_60 = arith.constant 7 : index
    %c0_61 = arith.constant 0 : index
    %c0_62 = arith.constant 0 : index
    %77 = vector.load %arg4[%c7_60, %c0_61, %c0_62] : memref<9x32x64xbf16, #tpu.memory_space<vmem>>, vector<1x32x64xbf16>
    %78 = vector.shape_cast %77 : vector<1x32x64xbf16> to vector<32x64xbf16>
    %cst_63 = arith.constant dense<0.000000e+00> : vector<8x64xf32>
    %79 = tpu.matmul %76, %78, %cst_63 {dimension_numbers = #tpu.dot_dimension_numbers<[1], [0], [0], [1], [0, 0, 1, 1], [], []>} : vector<8x32xbf16>, vector<32x64xbf16>, vector<8x64xf32> -> vector<8x64xf32>
    %80 = arith.addf %72, %79 : vector<8x64xf32>
    %c8 = arith.constant 8 : index
    %c0_64 = arith.constant 0 : index
    %c0_65 = arith.constant 0 : index
    %81 = vector.load %arg3[%c8, %c0_64, %c0_65] : memref<9x8x32xbf16, #tpu.memory_space<vmem>>, vector<1x8x32xbf16>
    %82 = vector.shape_cast %81 : vector<1x8x32xbf16> to vector<8x32xbf16>
    %cst_66 = arith.constant dense<0.000000e+00> : vector<8x32xf32>
    %83 = tpu.matmul %82, %15, %cst_66 {dimension_numbers = #tpu.dot_dimension_numbers<[1], [0], [0], [1], [0, 0, 1, 1], [], []>} : vector<8x32xbf16>, vector<32x32xbf16>, vector<8x32xf32> -> vector<8x32xf32>
    %84 = arith.truncf %83 : vector<8x32xf32> to vector<8x32xbf16>
    %c8_67 = arith.constant 8 : index
    %c0_68 = arith.constant 0 : index
    %c0_69 = arith.constant 0 : index
    %85 = vector.load %arg4[%c8_67, %c0_68, %c0_69] : memref<9x32x64xbf16, #tpu.memory_space<vmem>>, vector<1x32x64xbf16>
    %86 = vector.shape_cast %85 : vector<1x32x64xbf16> to vector<32x64xbf16>
    %cst_70 = arith.constant dense<0.000000e+00> : vector<8x64xf32>
    %87 = tpu.matmul %84, %86, %cst_70 {dimension_numbers = #tpu.dot_dimension_numbers<[1], [0], [0], [1], [0, 0, 1, 1], [], []>} : vector<8x32xbf16>, vector<32x64xbf16>, vector<8x64xf32> -> vector<8x64xf32>
    %88 = arith.addf %80, %87 : vector<8x64xf32>
    %c0_71 = arith.constant 0 : index
    %c0_72 = arith.constant 0 : index
    %89 = vector.load %arg5[%c0_71, %c0_72] : memref<1x64xf32, #tpu.memory_space<vmem>>, vector<1x64xf32>
    %90 = vector.broadcast %89 : vector<1x64xf32> to vector<8x64xf32>
    %91 = arith.addf %88, %90 : vector<8x64xf32>
    %cst_73 = arith.constant 0.000000e+00 : f32
    %92 = vector.broadcast %cst_73 : f32 to vector<8x64xf32>
    %93 = arith.maximumf %91, %92 : vector<8x64xf32>
    %94 = arith.truncf %93 : vector<8x64xf32> to vector<8x64xbf16>
    %cst_74 = arith.constant 0.000000e+00 : f32
    %95 = vector.broadcast %cst_74 : f32 to vector<8x64xf32>
    %c0_75 = arith.constant 0 : index
    %c0_76 = arith.constant 0 : index
    %c0_77 = arith.constant 0 : index
    %96 = vector.load %arg6[%c0_75, %c0_76, %c0_77] : memref<9x8x8xbf16, #tpu.memory_space<vmem>>, vector<1x8x8xbf16>
    %97 = vector.shape_cast %96 : vector<1x8x8xbf16> to vector<8x8xbf16>
    %cst_78 = arith.constant dense<0.000000e+00> : vector<8x64xf32>
    %98 = tpu.matmul %97, %94, %cst_78 {dimension_numbers = #tpu.dot_dimension_numbers<[1], [0], [0], [1], [0, 0, 1, 1], [], []>} : vector<8x8xbf16>, vector<8x64xbf16>, vector<8x64xf32> -> vector<8x64xf32>
    %99 = arith.truncf %98 : vector<8x64xf32> to vector<8x64xbf16>
    %c0_79 = arith.constant 0 : index
    %c0_80 = arith.constant 0 : index
    %c0_81 = arith.constant 0 : index
    %100 = vector.load %arg7[%c0_79, %c0_80, %c0_81] : memref<9x64x64xbf16, #tpu.memory_space<vmem>>, vector<1x64x64xbf16>
    %101 = vector.shape_cast %100 : vector<1x64x64xbf16> to vector<64x64xbf16>
    %cst_82 = arith.constant dense<0.000000e+00> : vector<8x64xf32>
    %102 = tpu.matmul %99, %101, %cst_82 {dimension_numbers = #tpu.dot_dimension_numbers<[1], [0], [0], [1], [0, 0, 1, 1], [], []>} : vector<8x64xbf16>, vector<64x64xbf16>, vector<8x64xf32> -> vector<8x64xf32>
    %103 = arith.addf %95, %102 : vector<8x64xf32>
    %c1_83 = arith.constant 1 : index
    %c0_84 = arith.constant 0 : index
    %c0_85 = arith.constant 0 : index
    %104 = vector.load %arg6[%c1_83, %c0_84, %c0_85] : memref<9x8x8xbf16, #tpu.memory_space<vmem>>, vector<1x8x8xbf16>
    %105 = vector.shape_cast %104 : vector<1x8x8xbf16> to vector<8x8xbf16>
    %cst_86 = arith.constant dense<0.000000e+00> : vector<8x64xf32>
    %106 = tpu.matmul %105, %94, %cst_86 {dimension_numbers = #tpu.dot_dimension_numbers<[1], [0], [0], [1], [0, 0, 1, 1], [], []>} : vector<8x8xbf16>, vector<8x64xbf16>, vector<8x64xf32> -> vector<8x64xf32>
    %107 = arith.truncf %106 : vector<8x64xf32> to vector<8x64xbf16>
    %c1_87 = arith.constant 1 : index
    %c0_88 = arith.constant 0 : index
    %c0_89 = arith.constant 0 : index
    %108 = vector.load %arg7[%c1_87, %c0_88, %c0_89] : memref<9x64x64xbf16, #tpu.memory_space<vmem>>, vector<1x64x64xbf16>
    %109 = vector.shape_cast %108 : vector<1x64x64xbf16> to vector<64x64xbf16>
    %cst_90 = arith.constant dense<0.000000e+00> : vector<8x64xf32>
    %110 = tpu.matmul %107, %109, %cst_90 {dimension_numbers = #tpu.dot_dimension_numbers<[1], [0], [0], [1], [0, 0, 1, 1], [], []>} : vector<8x64xbf16>, vector<64x64xbf16>, vector<8x64xf32> -> vector<8x64xf32>
    %111 = arith.addf %103, %110 : vector<8x64xf32>
    %c2_91 = arith.constant 2 : index
    %c0_92 = arith.constant 0 : index
    %c0_93 = arith.constant 0 : index
    %112 = vector.load %arg6[%c2_91, %c0_92, %c0_93] : memref<9x8x8xbf16, #tpu.memory_space<vmem>>, vector<1x8x8xbf16>
    %113 = vector.shape_cast %112 : vector<1x8x8xbf16> to vector<8x8xbf16>
    %cst_94 = arith.constant dense<0.000000e+00> : vector<8x64xf32>
    %114 = tpu.matmul %113, %94, %cst_94 {dimension_numbers = #tpu.dot_dimension_numbers<[1], [0], [0], [1], [0, 0, 1, 1], [], []>} : vector<8x8xbf16>, vector<8x64xbf16>, vector<8x64xf32> -> vector<8x64xf32>
    %115 = arith.truncf %114 : vector<8x64xf32> to vector<8x64xbf16>
    %c2_95 = arith.constant 2 : index
    %c0_96 = arith.constant 0 : index
    %c0_97 = arith.constant 0 : index
    %116 = vector.load %arg7[%c2_95, %c0_96, %c0_97] : memref<9x64x64xbf16, #tpu.memory_space<vmem>>, vector<1x64x64xbf16>
    %117 = vector.shape_cast %116 : vector<1x64x64xbf16> to vector<64x64xbf16>
    %cst_98 = arith.constant dense<0.000000e+00> : vector<8x64xf32>
    %118 = tpu.matmul %115, %117, %cst_98 {dimension_numbers = #tpu.dot_dimension_numbers<[1], [0], [0], [1], [0, 0, 1, 1], [], []>} : vector<8x64xbf16>, vector<64x64xbf16>, vector<8x64xf32> -> vector<8x64xf32>
    %119 = arith.addf %111, %118 : vector<8x64xf32>
    %c3_99 = arith.constant 3 : index
    %c0_100 = arith.constant 0 : index
    %c0_101 = arith.constant 0 : index
    %120 = vector.load %arg6[%c3_99, %c0_100, %c0_101] : memref<9x8x8xbf16, #tpu.memory_space<vmem>>, vector<1x8x8xbf16>
    %121 = vector.shape_cast %120 : vector<1x8x8xbf16> to vector<8x8xbf16>
    %cst_102 = arith.constant dense<0.000000e+00> : vector<8x64xf32>
    %122 = tpu.matmul %121, %94, %cst_102 {dimension_numbers = #tpu.dot_dimension_numbers<[1], [0], [0], [1], [0, 0, 1, 1], [], []>} : vector<8x8xbf16>, vector<8x64xbf16>, vector<8x64xf32> -> vector<8x64xf32>
    %123 = arith.truncf %122 : vector<8x64xf32> to vector<8x64xbf16>
    %c3_103 = arith.constant 3 : index
    %c0_104 = arith.constant 0 : index
    %c0_105 = arith.constant 0 : index
    %124 = vector.load %arg7[%c3_103, %c0_104, %c0_105] : memref<9x64x64xbf16, #tpu.memory_space<vmem>>, vector<1x64x64xbf16>
    %125 = vector.shape_cast %124 : vector<1x64x64xbf16> to vector<64x64xbf16>
    %cst_106 = arith.constant dense<0.000000e+00> : vector<8x64xf32>
    %126 = tpu.matmul %123, %125, %cst_106 {dimension_numbers = #tpu.dot_dimension_numbers<[1], [0], [0], [1], [0, 0, 1, 1], [], []>} : vector<8x64xbf16>, vector<64x64xbf16>, vector<8x64xf32> -> vector<8x64xf32>
    %127 = arith.addf %119, %126 : vector<8x64xf32>
    %c4_107 = arith.constant 4 : index
    %c0_108 = arith.constant 0 : index
    %c0_109 = arith.constant 0 : index
    %128 = vector.load %arg6[%c4_107, %c0_108, %c0_109] : memref<9x8x8xbf16, #tpu.memory_space<vmem>>, vector<1x8x8xbf16>
    %129 = vector.shape_cast %128 : vector<1x8x8xbf16> to vector<8x8xbf16>
    %cst_110 = arith.constant dense<0.000000e+00> : vector<8x64xf32>
    %130 = tpu.matmul %129, %94, %cst_110 {dimension_numbers = #tpu.dot_dimension_numbers<[1], [0], [0], [1], [0, 0, 1, 1], [], []>} : vector<8x8xbf16>, vector<8x64xbf16>, vector<8x64xf32> -> vector<8x64xf32>
    %131 = arith.truncf %130 : vector<8x64xf32> to vector<8x64xbf16>
    %c4_111 = arith.constant 4 : index
    %c0_112 = arith.constant 0 : index
    %c0_113 = arith.constant 0 : index
    %132 = vector.load %arg7[%c4_111, %c0_112, %c0_113] : memref<9x64x64xbf16, #tpu.memory_space<vmem>>, vector<1x64x64xbf16>
    %133 = vector.shape_cast %132 : vector<1x64x64xbf16> to vector<64x64xbf16>
    %cst_114 = arith.constant dense<0.000000e+00> : vector<8x64xf32>
    %134 = tpu.matmul %131, %133, %cst_114 {dimension_numbers = #tpu.dot_dimension_numbers<[1], [0], [0], [1], [0, 0, 1, 1], [], []>} : vector<8x64xbf16>, vector<64x64xbf16>, vector<8x64xf32> -> vector<8x64xf32>
    %135 = arith.addf %127, %134 : vector<8x64xf32>
    %c5_115 = arith.constant 5 : index
    %c0_116 = arith.constant 0 : index
    %c0_117 = arith.constant 0 : index
    %136 = vector.load %arg6[%c5_115, %c0_116, %c0_117] : memref<9x8x8xbf16, #tpu.memory_space<vmem>>, vector<1x8x8xbf16>
    %137 = vector.shape_cast %136 : vector<1x8x8xbf16> to vector<8x8xbf16>
    %cst_118 = arith.constant dense<0.000000e+00> : vector<8x64xf32>
    %138 = tpu.matmul %137, %94, %cst_118 {dimension_numbers = #tpu.dot_dimension_numbers<[1], [0], [0], [1], [0, 0, 1, 1], [], []>} : vector<8x8xbf16>, vector<8x64xbf16>, vector<8x64xf32> -> vector<8x64xf32>
    %139 = arith.truncf %138 : vector<8x64xf32> to vector<8x64xbf16>
    %c5_119 = arith.constant 5 : index
    %c0_120 = arith.constant 0 : index
    %c0_121 = arith.constant 0 : index
    %140 = vector.load %arg7[%c5_119, %c0_120, %c0_121] : memref<9x64x64xbf16, #tpu.memory_space<vmem>>, vector<1x64x64xbf16>
    %141 = vector.shape_cast %140 : vector<1x64x64xbf16> to vector<64x64xbf16>
    %cst_122 = arith.constant dense<0.000000e+00> : vector<8x64xf32>
    %142 = tpu.matmul %139, %141, %cst_122 {dimension_numbers = #tpu.dot_dimension_numbers<[1], [0], [0], [1], [0, 0, 1, 1], [], []>} : vector<8x64xbf16>, vector<64x64xbf16>, vector<8x64xf32> -> vector<8x64xf32>
    %143 = arith.addf %135, %142 : vector<8x64xf32>
    %c6_123 = arith.constant 6 : index
    %c0_124 = arith.constant 0 : index
    %c0_125 = arith.constant 0 : index
    %144 = vector.load %arg6[%c6_123, %c0_124, %c0_125] : memref<9x8x8xbf16, #tpu.memory_space<vmem>>, vector<1x8x8xbf16>
    %145 = vector.shape_cast %144 : vector<1x8x8xbf16> to vector<8x8xbf16>
    %cst_126 = arith.constant dense<0.000000e+00> : vector<8x64xf32>
    %146 = tpu.matmul %145, %94, %cst_126 {dimension_numbers = #tpu.dot_dimension_numbers<[1], [0], [0], [1], [0, 0, 1, 1], [], []>} : vector<8x8xbf16>, vector<8x64xbf16>, vector<8x64xf32> -> vector<8x64xf32>
    %147 = arith.truncf %146 : vector<8x64xf32> to vector<8x64xbf16>
    %c6_127 = arith.constant 6 : index
    %c0_128 = arith.constant 0 : index
    %c0_129 = arith.constant 0 : index
    %148 = vector.load %arg7[%c6_127, %c0_128, %c0_129] : memref<9x64x64xbf16, #tpu.memory_space<vmem>>, vector<1x64x64xbf16>
    %149 = vector.shape_cast %148 : vector<1x64x64xbf16> to vector<64x64xbf16>
    %cst_130 = arith.constant dense<0.000000e+00> : vector<8x64xf32>
    %150 = tpu.matmul %147, %149, %cst_130 {dimension_numbers = #tpu.dot_dimension_numbers<[1], [0], [0], [1], [0, 0, 1, 1], [], []>} : vector<8x64xbf16>, vector<64x64xbf16>, vector<8x64xf32> -> vector<8x64xf32>
    %151 = arith.addf %143, %150 : vector<8x64xf32>
    %c7_131 = arith.constant 7 : index
    %c0_132 = arith.constant 0 : index
    %c0_133 = arith.constant 0 : index
    %152 = vector.load %arg6[%c7_131, %c0_132, %c0_133] : memref<9x8x8xbf16, #tpu.memory_space<vmem>>, vector<1x8x8xbf16>
    %153 = vector.shape_cast %152 : vector<1x8x8xbf16> to vector<8x8xbf16>
    %cst_134 = arith.constant dense<0.000000e+00> : vector<8x64xf32>
    %154 = tpu.matmul %153, %94, %cst_134 {dimension_numbers = #tpu.dot_dimension_numbers<[1], [0], [0], [1], [0, 0, 1, 1], [], []>} : vector<8x8xbf16>, vector<8x64xbf16>, vector<8x64xf32> -> vector<8x64xf32>
    %155 = arith.truncf %154 : vector<8x64xf32> to vector<8x64xbf16>
    %c7_135 = arith.constant 7 : index
    %c0_136 = arith.constant 0 : index
    %c0_137 = arith.constant 0 : index
    %156 = vector.load %arg7[%c7_135, %c0_136, %c0_137] : memref<9x64x64xbf16, #tpu.memory_space<vmem>>, vector<1x64x64xbf16>
    %157 = vector.shape_cast %156 : vector<1x64x64xbf16> to vector<64x64xbf16>
    %cst_138 = arith.constant dense<0.000000e+00> : vector<8x64xf32>
    %158 = tpu.matmul %155, %157, %cst_138 {dimension_numbers = #tpu.dot_dimension_numbers<[1], [0], [0], [1], [0, 0, 1, 1], [], []>} : vector<8x64xbf16>, vector<64x64xbf16>, vector<8x64xf32> -> vector<8x64xf32>
    %159 = arith.addf %151, %158 : vector<8x64xf32>
    %c8_139 = arith.constant 8 : index
    %c0_140 = arith.constant 0 : index
    %c0_141 = arith.constant 0 : index
    %160 = vector.load %arg6[%c8_139, %c0_140, %c0_141] : memref<9x8x8xbf16, #tpu.memory_space<vmem>>, vector<1x8x8xbf16>
    %161 = vector.shape_cast %160 : vector<1x8x8xbf16> to vector<8x8xbf16>
    %cst_142 = arith.constant dense<0.000000e+00> : vector<8x64xf32>
    %162 = tpu.matmul %161, %94, %cst_142 {dimension_numbers = #tpu.dot_dimension_numbers<[1], [0], [0], [1], [0, 0, 1, 1], [], []>} : vector<8x8xbf16>, vector<8x64xbf16>, vector<8x64xf32> -> vector<8x64xf32>
    %163 = arith.truncf %162 : vector<8x64xf32> to vector<8x64xbf16>
    %c8_143 = arith.constant 8 : index
    %c0_144 = arith.constant 0 : index
    %c0_145 = arith.constant 0 : index
    %164 = vector.load %arg7[%c8_143, %c0_144, %c0_145] : memref<9x64x64xbf16, #tpu.memory_space<vmem>>, vector<1x64x64xbf16>
    %165 = vector.shape_cast %164 : vector<1x64x64xbf16> to vector<64x64xbf16>
    %cst_146 = arith.constant dense<0.000000e+00> : vector<8x64xf32>
    %166 = tpu.matmul %163, %165, %cst_146 {dimension_numbers = #tpu.dot_dimension_numbers<[1], [0], [0], [1], [0, 0, 1, 1], [], []>} : vector<8x64xbf16>, vector<64x64xbf16>, vector<8x64xf32> -> vector<8x64xf32>
    %167 = arith.addf %159, %166 : vector<8x64xf32>
    %c0_147 = arith.constant 0 : index
    %c0_148 = arith.constant 0 : index
    %168 = vector.load %arg8[%c0_147, %c0_148] : memref<8x32xbf16, #tpu.memory_space<vmem>>, vector<8x32xbf16>
    %cst_149 = arith.constant dense<0.000000e+00> : vector<8x32xf32>
    %169 = tpu.matmul %168, %15, %cst_149 {dimension_numbers = #tpu.dot_dimension_numbers<[1], [0], [0], [1], [0, 0, 1, 1], [], []>} : vector<8x32xbf16>, vector<32x32xbf16>, vector<8x32xf32> -> vector<8x32xf32>
    %170 = arith.truncf %169 : vector<8x32xf32> to vector<8x32xbf16>
    %c0_150 = arith.constant 0 : index
    %c0_151 = arith.constant 0 : index
    %171 = vector.load %arg9[%c0_150, %c0_151] : memref<32x64xbf16, #tpu.memory_space<vmem>>, vector<32x64xbf16>
    %cst_152 = arith.constant dense<0.000000e+00> : vector<8x64xf32>
    %172 = tpu.matmul %170, %171, %cst_152 {dimension_numbers = #tpu.dot_dimension_numbers<[1], [0], [0], [1], [0, 0, 1, 1], [], []>} : vector<8x32xbf16>, vector<32x64xbf16>, vector<8x64xf32> -> vector<8x64xf32>
    %173 = arith.addf %167, %172 : vector<8x64xf32>
    %c0_153 = arith.constant 0 : index
    %c0_154 = arith.constant 0 : index
    %174 = vector.load %arg10[%c0_153, %c0_154] : memref<1x64xf32, #tpu.memory_space<vmem>>, vector<1x64xf32>
    %175 = vector.broadcast %174 : vector<1x64xf32> to vector<8x64xf32>
    %176 = arith.addf %173, %175 : vector<8x64xf32>
    %cst_155 = arith.constant 0.000000e+00 : f32
    %177 = vector.broadcast %cst_155 : f32 to vector<8x64xf32>
    %178 = arith.maximumf %176, %177 : vector<8x64xf32>
    %c0_156 = arith.constant 0 : index
    %c0_157 = arith.constant 0 : index
    %179 = vector.load %arg11[%c0_156, %c0_157] : memref<2x8xf32, #tpu.memory_space<vmem>>, vector<2x8xf32>
    %cst_158 = arith.constant dense<0.000000e+00> : vector<2x64xf32>
    %180 = tpu.matmul %179, %178, %cst_158 {dimension_numbers = #tpu.dot_dimension_numbers<[1], [0], [0], [1], [0, 0, 1, 1], [], []>} : vector<2x8xf32>, vector<8x64xf32>, vector<2x64xf32> -> vector<2x64xf32>
    %c0_159 = arith.constant 0 : index
    %c0_160 = arith.constant 0 : index
    %181 = vector.load %arg12[%c0_159, %c0_160] : memref<64x128xf32, #tpu.memory_space<vmem>>, vector<64x128xf32>
    %cst_161 = arith.constant dense<0.000000e+00> : vector<2x128xf32>
    %182 = tpu.matmul %180, %181, %cst_161 {dimension_numbers = #tpu.dot_dimension_numbers<[1], [0], [0], [1], [0, 0, 1, 1], [], []>} : vector<2x64xf32>, vector<64x128xf32>, vector<2x128xf32> -> vector<2x128xf32>
    %c0_162 = arith.constant 0 : index
    %c0_163 = arith.constant 0 : index
    %183 = vector.load %arg13[%c0_162, %c0_163] : memref<1x128xf32, #tpu.memory_space<vmem>>, vector<1x128xf32>
    %184 = vector.broadcast %183 : vector<1x128xf32> to vector<2x128xf32>
    %185 = arith.addf %182, %184 : vector<2x128xf32>
    %c0_164 = arith.constant 0 : index
    %c0_165 = arith.constant 0 : index
    %186 = vector.load %arg14[%c0_164, %c0_165] : memref<2x128xf32, #tpu.memory_space<vmem>>, vector<2x128xf32>
    tpu.vector_store %arg14[%c0_164, %c0_165], %185 {strides = array<i32>} : memref<2x128xf32, #tpu.memory_space<vmem>>, vector<2x128xf32>,
    return
  }
}

</mosaic_0001>

<bundles_post_ra>
// kernel: _lambda_.1
= control target key start
LH: loop header
LB: loop body
LE: loop exit
PB: predicated region body
PF: predicated region fallthrough
CT: control target
= control target key end

     0   :  { %s4196_s0 = inlined_call_operand.vmem [shape: bf16[128,128], index: 0, kind: input, shape index: {}]   ;;  %s4197_s1 = inlined_call_operand.vmem [shape: bf16[128,32], index: 1, kind: input, shape index: {}]   ;;  %s4198_s2 = inlined_call_operand.vmem [shape: f32[1,32], index: 2, kind: input, shape index: {}]   ;;  %s4199_s3 = inlined_call_operand.vmem [shape: bf16[9,8,32], index: 3, kind: input, shape index: {}]   ;;  %s4200_s4 = inlined_call_operand.vmem [shape: bf16[9,32,64], index: 4, kind: input, shape index: {}]   ;;  %s4201_s5 = inlined_call_operand.vmem [shape: f32[1,64], index: 5, kind: input, shape index: {}]   ;;  %s4202_s6 = inlined_call_operand.vmem [shape: bf16[9,8,8], index: 6, kind: input, shape index: {}]   ;;  %s4203_s7 = inlined_call_operand.vmem [shape: bf16[9,64,64], index: 7, kind: input, shape index: {}]   ;;  %s4204_s8 = inlined_call_operand.vmem [shape: bf16[8,32], index: 8, kind: input, shape index: {}]   ;;  %s4205_s9 = inlined_call_operand.vmem [shape: bf16[32,64], index: 9, kind: input, shape index: {}]   ;;  %s4206_s10 = inlined_call_operand.vmem [shape: f32[1,64], index: 10, kind: input, shape index: {}]   ;;  %s4207_s11 = inlined_call_operand.vmem [shape: f32[2,8], index: 11, kind: input, shape index: {}]   ;;  %s4208_s12 = inlined_call_operand.vmem [shape: f32[64,128], index: 12, kind: input, shape index: {}]   ;;  %s4209_s13 = inlined_call_operand.vmem [shape: f32[1,128], index: 13, kind: input, shape index: {}]   ;;  %s4210_s14 = inlined_call_operand.hbm [shape: f32[2,128], index: 14, kind: output, shape index: {}]  }
   0x1   :  { %v3453_v0 = vld [vmem:[%s4197_s1] sm:$0xff]   ;;  %v3454_v1 = vld [vmem:[%s4197_s1 + $0x8] sm:$0xff]   ;;  %v3455_v2 = vld [vmem:[%s4197_s1 + $0x10] sm:$0xff]  }
   0x2   :  { %3059 = vmatprep.subr.bf16.mxu0 %v3453_v0  ;;  %v3456_v3 = vld [vmem:[%s4197_s1 + $0x18] sm:$0xff]   ;;  %v3461_v4 = vld [vmem:[%s4196_s0] sm:$0xff]   ;;  %v3458_v6 = vld [vmem:[%s4197_s1 + $0x28] sm:$0xff]  }
   0x3   :  { %3060 = vmatpush3.bf16.msra.mxu0 %v3453_v0  ;;  %3075 = vmatprep.mubr.bf16.mxu0 %v3461_v4  ;;  %v3457_v5 = vld [vmem:[%s4197_s1 + $0x20] sm:$0xff]   ;;  %v3459_v7 = vld [vmem:[%s4197_s1 + $0x30] sm:$0xff]   ;;  %v3460_v8 = vld [vmem:[%s4197_s1 + $0x38] sm:$0xff]  }
   0x4   :  { %3061 = vmatprep.subr.bf16.mxu0 %v3454_v1  ;;  %v3462_v9 = vld [vmem:[%s4196_s0 + $0x8] sm:$0xff]   ;;  %v3463_v10 = vld [vmem:[%s4196_s0 + $0x10] sm:$0xff]   ;;  %v3464_v11 = vld [vmem:[%s4196_s0 + $0x18] sm:$0xff]  }
   0x5   :  { %v3465_v12 = vld [vmem:[%s4196_s0 + $0x20] sm:$0xff]   ;;  %v3466_v13 = vld [vmem:[%s4196_s0 + $0x28] sm:$0xff]   ;;  %v3467_v14 = vld [vmem:[%s4196_s0 + $0x30] sm:$0xff]  }
   0x7   :  { %3062 = vmatpush3.bf16.msra.mxu0 %v3454_v1 }
   0x8   :  { %3063 = vmatprep.subr.bf16.mxu0 %v3455_v2 }
   0xb   :  { %3064 = vmatpush3.bf16.msra.mxu0 %v3455_v2 }
   0xc   :  { %3065 = vmatprep.subr.bf16.mxu0 %v3456_v3 }
   0xf   :  { %3066 = vmatpush3.bf16.msra.mxu0 %v3456_v3 }
  0x10   :  { %3067 = vmatprep.subr.bf16.mxu0 %v3457_v5 }
  0x13   :  { %3068 = vmatpush3.bf16.msra.mxu0 %v3457_v5 }
  0x14   :  { %3069 = vmatprep.subr.bf16.mxu0 %v3458_v6 }
  0x17   :  { %3070 = vmatpush3.bf16.msra.mxu0 %v3458_v6 }
  0x18   :  { %3071 = vmatprep.subr.bf16.mxu0 %v3459_v7 }
  0x1b   :  { %3072 = vmatpush3.bf16.msra.mxu0 %v3459_v7 }
  0x1c   :  { %3073 = vmatprep.subr.bf16.mxu0 %v3460_v8 }
  0x1f   :  { %3074 = vmatpush3.bf16.msra.mxu0 %v3460_v8 }
  0x22   :  { %3076 = vmatmul.mubr.bf16.vlgmr.msra.gmra.mrb[0].mxu0 %v3462_v9 }
  0x23   :  { %3079 = vmatprep.mubr.bf16.mxu0 %v3463_v10 }
  0x2a   :  { %3080 = vmatmul.mubr.bf16.gmra.mrb[4].mxu0 %v3464_v11 }
  0x2b   :  { %3083 = vmatprep.mubr.bf16.mxu0 %v3465_v12 }
  0x32   :  { %3084 = vmatmul.mubr.bf16.gmra.mrb[8].mxu0 %v3466_v13 }
  0x33   :  { %3087 = vmatprep.mubr.bf16.mxu0 %v3467_v14 }
  0x34   :  { %19 = vsyncpa [#allocation3], 0  ;;  %v3468_v15 = vld [vmem:[%s4196_s0 + $0x38] sm:$0xff]   ;;  %v3549_v16 = vmov 0.0   ;;  %vm3550_vm0 = vmmov 0   ;;  %vm312_vm1 = vcmask 261120  }
  0x35   :  { %3091 = vmatprep.subr.bf16.mxu1 %v3549_v16  ;;  %3147 = vmatprep.subr.bf16.mxu0 %v3549_v16  ;;  %v2681_v21 = vld [vmem:[%s4198_s2] ss:$0 sm:$0xff]  ;;  %vm1286_vm2 = vcmask 1043456   ;;  %vm1282_vm3 = vcmask 64512   ;;  %vm1418_vm4 = vcmask 523264  }
  0x36   :  { %3095 = vmatprep.mubr.msk.bf16.mxu1 %vm3550_vm0, %v3549_v16 }
  0x3a   :  { %3088 = vmatmul.mubr.bf16.gmra.mrb[12].mxu0 %v3468_v15 }
  0x3b   :  { %3151 = vmatprep.mubr.msk.bf16.mxu0 %vm3550_vm0, %v3549_v16 }
  0xf5   :  { %v3077_v17 = vpop.f32.mrb[0].mxu0 }
  0xf6   :  { %v218_v18 = vpop.f32.mrb[1].mxu0  ;;  %v227_v22 = vadd.f32 %v3077_v17, %v2681_v21  ;;  %v311_v17 = vld [vmem:[%s4199_s3] sm:$0xf] }
  0xf7   :  { %v3078_v19 = vpop.f32.mrb[2].mxu0  ;;  %v219_v23 = vadd.f32 %v2681_v21, %v218_v18  ;;  %v2699_v18 = vld [vmem:[%s4199_s3 + $0x4] sm:$0xf] }
  0xf8   :  { %v221_v20 = vpop.f32.mrb[3].mxu0  ;;  %v230_v25 = vadd.f32 %v3078_v19, %v2681_v21  ;;  %v283_v31 = vmax.f32 %v227_v22, 0.0  ;;  %v3469_v19 = vld [vmem:[%s4200_s4 + $0x10] sm:$0xff]  }
  0xf9   :  { %v222_v28 = vadd.f32 %v2681_v21, %v221_v20  ;;  %v281_v35 = vmax.f32 %v219_v23, 0.0  ;;  %v3470_v20 = vld [vmem:[%s4200_s4 + $0x18] sm:$0xff]  }
  0xfa   :  { %v284_v38 = vmax.f32 %v230_v25, 0.0 }
  0xfb   :  { %v282_v41 = vmax.f32 %v222_v28, 0.0 }
  0xfd   :  { %v3081_v24 = vpop.f32.mrb[4].mxu0 }
  0xfe   :  { %v243_v26 = vadd.f32 %v3081_v24, %v2681_v21  ;;  %v234_v27 = vpop.f32.mrb[5].mxu0 }
  0xff   :  { %v235_v29 = vadd.f32 %v2681_v21, %v234_v27  ;;  %v3082_v30 = vpop.f32.mrb[6].mxu0 }
 0x100   :  { %v287_v32 = vmax.f32 %v243_v26, 0.0  ;;  %v246_v33 = vadd.f32 %v3082_v30, %v2681_v21  ;;  %v237_v34 = vpop.f32.mrb[7].mxu0  ;;  %v3471_v26 = vld [vmem:[%s4200_s4] sm:$0xff]  }
 0x101   :  { %v285_v36 = vmax.f32 %v235_v29, 0.0  ;;  %v238_v37 = vadd.f32 %v2681_v21, %v237_v34  ;;  %v3473_v34 = vld [vmem:[%s4200_s4 + $0x20] sm:$0xff]  }
 0x102   :  { %v299_v39 = vmax.f32 %v283_v31, %v287_v32  ;;  %v288_v40 = vmax.f32 %v246_v33, 0.0  ;;  %v3472_v31 = vld [vmem:[%s4200_s4 + $0x8] sm:$0xff]  }
 0x103   :  { %v297_v42 = vmax.f32 %v281_v35, %v285_v36  ;;  %v286_v43 = vmax.f32 %v238_v37, 0.0  ;;  %v2711_v33 = vld [vmem:[%s4199_s3 + $0x8] sm:$0xf]  ;;  %v3475_v36 = vld [vmem:[%s4200_s4 + $0x30] sm:$0xff]  }
 0x104   :  { %v300_v44 = vmax.f32 %v284_v38, %v288_v40  ;;  %v3474_v35 = vld [vmem:[%s4200_s4 + $0x28] sm:$0xff]   ;;  %3148 = vmatpush3.bf16.msra.mxu0 %v3475_v36 }
 0x105   :  { %v298_v45 = vmax.f32 %v282_v41, %v286_v43  ;;  %v3085_v46 = vpop.f32.mrb[8].mxu0  ;;  %3149 = vmatprep.subr.bf16.mxu0 %v3549_v16  ;;  %v3486_v36 = vld [vmem:[%s4200_s4 + $0x88] sm:$0xff]  }
 0x106   :  { %v250_v47 = vpop.f32.mrb[9].mxu0  ;;  %v259_v50 = vadd.f32 %v3085_v46, %v2681_v21 }
 0x107   :  { %v3086_v48 = vpop.f32.mrb[10].mxu0  ;;  %v251_v51 = vadd.f32 %v2681_v21, %v250_v47 }
 0x108   :  { %v253_v49 = vpop.f32.mrb[11].mxu0  ;;  %v262_v53 = vadd.f32 %v3086_v48, %v2681_v21  ;;  %v291_v59 = vmax.f32 %v259_v50, 0.0 }
 0x109   :  { %v254_v56 = vadd.f32 %v2681_v21, %v253_v49  ;;  %v289_v63 = vmax.f32 %v251_v51, 0.0  ;;  %v2720_v51 = vld [vmem:[%s4199_s3 + $0xc] sm:$0xf] }
 0x10a   :  { %v292_v2 = vmax.f32 %v262_v53, 0.0  ;;  %v2738_v53 = vld [vmem:[%s4199_s3 + $0x14] sm:$0xf] }
 0x10b   :  { %v290_v5 = vmax.f32 %v254_v56, 0.0  ;;  %v2765_v56 = vld [vmem:[%s4199_s3 + $0x20] sm:$0xf] }
 0x10d   :  { %v3089_v52 = vpop.f32.mrb[12].mxu0 }
 0x10e   :  { %v275_v54 = vadd.f32 %v3089_v52, %v2681_v21  ;;  %v266_v55 = vpop.f32.mrb[13].mxu0  ;;  %v2729_v52 = vld [vmem:[%s4199_s3 + $0x10] sm:$0xf] }
 0x10f   :  { %v267_v57 = vadd.f32 %v2681_v21, %v266_v55  ;;  %v3090_v58 = vpop.f32.mrb[14].mxu0  ;;  %v2756_v55 = vld [vmem:[%s4199_s3 + $0x1c] sm:$0xf] }
 0x110   :  { %v295_v60 = vmax.f32 %v275_v54, 0.0  ;;  %v278_v61 = vadd.f32 %v3090_v58, %v2681_v21  ;;  %v269_v62 = vpop.f32.mrb[15].mxu0  ;;  %v2747_v54 = vld [vmem:[%s4199_s3 + $0x18] sm:$0xf] }
 0x111   :  { %v293_v0 = vmax.f32 %v267_v57, 0.0  ;;  %v270_v1 = vadd.f32 %v2681_v21, %v269_v62  ;;  %v3476_v57 = vld [vmem:[%s4200_s4 + $0x38] sm:$0xff]  }
 0x112   :  { %v303_v3 = vmax.f32 %v291_v59, %v295_v60  ;;  %v296_v4 = vmax.f32 %v278_v61, 0.0  ;;  %3150 = vmatpush3.bf16.msra.mxu0 %v3476_v57 }
 0x113   :  { %v301_v6 = vmax.f32 %v289_v63, %v293_v0  ;;  %v294_v7 = vmax.f32 %v270_v1, 0.0  ;;  %3163 = vmatprep.subr.bf16.mxu0 %v3549_v16  ;;  %v3477_v0 = vld [vmem:[%s4200_s4 + $0x40] sm:$0xff]  }
 0x114   :  { %v307_v8 = vmax.f32 %v299_v39, %v303_v3  ;;  %v304_v9 = vmax.f32 %v292_v2, %v296_v4 }
 0x115   :  { %v305_v10 = vmax.f32 %v297_v42, %v301_v6  ;;  %v302_v11 = vmax.f32 %v290_v5, %v294_v7  ;;  %v3478_v5 = vld [vmem:[%s4200_s4 + $0x48] sm:$0xff]   ;;  %v3479_v7 = vld [vmem:[%s4200_s4 + $0x50] sm:$0xff]  }
 0x116   :  { %v308_v12 = vmax.f32 %v300_v44, %v304_v9 }
 0x117   :  { %v306_v13 = vmax.f32 %v298_v45, %v302_v11 }
 0x118   :  { %v3685_v14 = vpack.c.bf16 %v308_v12, %v307_v8  ;;  %v3480_v12 = vld [vmem:[%s4200_s4 + $0x58] sm:$0xff]  }
 0x119   :  { %v3687_v15 = vpack.c.bf16 %v306_v13, %v305_v10 }
 0x11b   :  { %3092 = vmatpush3.bf16.msra.mxu1 %v3687_v15 }
 0x11c   :  { %3093 = vmatprep.subr.bf16.mxu1 %v3549_v16 }
 0x11f   :  { %3094 = vmatpush3.bf16.msra.mxu1 %v3685_v14 }
 0x120   :  { %3099 = vmatprep.subr.bf16.mxu1 %v3549_v16 }
 0x122   :  { %3096 = vmatmul.mubr.msk.bf16.vlgmr.msra.gmra.mrb[0].mxu1 %vm312_vm1, %v311_v17  ;;  %v3481_v17 = vld [vmem:[%s4200_s4 + $0x60] sm:$0xff]  }
 0x123   :  { %3100 = vmatpush3.bf16.msra.mxu1 %v3687_v15  ;;  %3103 = vmatprep.mubr.msk.bf16.mxu1 %vm3550_vm0, %v3549_v16 }
 0x124   :  { %3101 = vmatprep.subr.bf16.mxu1 %v3549_v16 }
 0x127   :  { %3102 = vmatpush3.bf16.msra.mxu1 %v3685_v14 }
 0x128   :  { %3107 = vmatprep.subr.bf16.mxu1 %v3549_v16 }
 0x12a   :  { %3104 = vmatmul.mubr.msk.bf16.vlgmr.msra.gmra.mrb[4].mxu1 %vm312_vm1, %v2699_v18 }
 0x12b   :  { %3111 = vmatprep.mubr.msk.bf16.mxu1 %vm3550_vm0, %v3549_v16  ;;  %3108 = vmatpush3.bf16.msra.mxu1 %v3469_v19 }
 0x12c   :  { %3109 = vmatprep.subr.bf16.mxu1 %v3549_v16 }
 0x12f   :  { %3110 = vmatpush3.bf16.msra.mxu1 %v3470_v20 }
 0x130   :  { %3115 = vmatprep.subr.bf16.mxu1 %v3549_v16 }
 0x1f5   :  { %v350_v21 = vpop.f32.mrb[0].mxu1 }
 0x1f6   :  { %v3097_v22 = vpop.f32.mrb[1].mxu1  ;;  %v356_v32 = vpack.c.bf16 %v350_v21, %v350_v21 }
 0x1f7   :  { %v353_v23 = vpop.f32.mrb[2].mxu1  ;;  %v3482_v22 = vld [vmem:[%s4200_s4 + $0x68] sm:$0xff]  }
 0x1f8   :  { %v3098_v24 = vpop.f32.mrb[3].mxu1 }
 0x1f9   :  { %v3483_v24 = vld [vmem:[%s4200_s4 + $0x70] sm:$0xff]  }
 0x1fd   :  { %v400_v25 = vpop.f32.mrb[4].mxu1 }
 0x1fe   :  { %v406_v27 = vpack.c.bf16 %v400_v25, %v400_v25  ;;  %v3105_v28 = vpop.f32.mrb[5].mxu1 }
 0x1ff   :  { %v403_v29 = vpop.f32.mrb[6].mxu1 }
 0x200   :  { %v3106_v30 = vpop.f32.mrb[7].mxu1  ;;  %3112 = vmatmul.mubr.msk.bf16.vlgmr.msra.gmra.mrb[8].mxu1 %vm312_vm1, %v406_v27  ;;  %v3484_v29 = vld [vmem:[%s4200_s4 + $0x78] sm:$0xff]  }
 0x201   :  { %3116 = vmatpush3.bf16.msra.mxu1 %v3471_v26  ;;  %3119 = vmatprep.mubr.msk.bf16.mxu1 %vm3550_vm0, %v3549_v16 }
 0x202   :  { %3117 = vmatprep.subr.bf16.mxu1 %v3549_v16 }
 0x205   :  { %3118 = vmatpush3.bf16.msra.mxu1 %v3472_v31  ;;  %v3485_v31 = vld [vmem:[%s4200_s4 + $0x80] sm:$0xff]  }
 0x206   :  { %3123 = vmatprep.subr.bf16.mxu1 %v3549_v16 }
 0x208   :  { %3120 = vmatmul.mubr.msk.bf16.vlgmr.msra.gmra.mrb[12].mxu1 %vm312_vm1, %v356_v32 }
 0x209   :  { %3124 = vmatpush3.bf16.msra.mxu1 %v3687_v15  ;;  %3127 = vmatprep.mubr.msk.bf16.mxu1 %vm3550_vm0, %v3549_v16 }
 0x20a   :  { %3125 = vmatprep.subr.bf16.mxu1 %v3549_v16 }
 0x20d   :  { %3126 = vmatpush3.bf16.msra.mxu1 %v3685_v14 }
 0x20e   :  { %3131 = vmatprep.subr.bf16.mxu1 %v3549_v16 }
 0x210   :  { %3128 = vmatmul.mubr.msk.bf16.vlgmr.msra.gmra.mrb[16].mxu1 %vm312_vm1, %v2711_v33 }
 0x211   :  { %3135 = vmatprep.mubr.msk.bf16.mxu1 %vm3550_vm0, %v3549_v16  ;;  %3132 = vmatpush3.bf16.msra.mxu1 %v3473_v34 }
 0x212   :  { %3133 = vmatprep.subr.bf16.mxu1 %v3549_v16 }
 0x215   :  { %3134 = vmatpush3.bf16.msra.mxu1 %v3474_v35 }
 0x216   :  { %3139 = vmatprep.subr.bf16.mxu1 %v3549_v16 }
 0x2d3   :  { %v461_v37 = vpop.f32.mrb[8].mxu1 }
 0x2d4   :  { %v3113_v38 = vpop.f32.mrb[9].mxu1 }
 0x2d5   :  { %v464_v39 = vpop.f32.mrb[10].mxu1 }
 0x2d6   :  { %v3114_v40 = vpop.f32.mrb[11].mxu1 }
 0x2db   :  { %v516_v41 = vpop.f32.mrb[12].mxu1 }
 0x2dc   :  { %v517_v42 = vadd.f32 %v516_v41, %v461_v37  ;;  %v3121_v43 = vpop.f32.mrb[13].mxu1 }
 0x2dd   :  { %v519_v44 = vpop.f32.mrb[14].mxu1 }
 0x2de   :  { %v3122_v45 = vpop.f32.mrb[15].mxu1 }
 0x2e3   :  { %v561_v46 = vpop.f32.mrb[16].mxu1 }
 0x2e4   :  { %v567_v47 = vpack.c.bf16 %v561_v46, %v561_v46  ;;  %v3129_v48 = vpop.f32.mrb[17].mxu1 }
 0x2e5   :  { %v564_v49 = vpop.f32.mrb[18].mxu1 }
 0x2e6   :  { %v3130_v50 = vpop.f32.mrb[19].mxu1  ;;  %3136 = vmatmul.mubr.msk.bf16.vlgmr.msra.gmra.mrb[20].mxu1 %vm312_vm1, %v567_v47 }
 0x2e7   :  { %3140 = vmatpush3.bf16.msra.mxu1 %v3687_v15  ;;  %3143 = vmatprep.mubr.msk.bf16.mxu1 %vm3550_vm0, %v3549_v16 }
 0x2e8   :  { %3141 = vmatprep.subr.bf16.mxu1 %v3549_v16 }
 0x2eb   :  { %3142 = vmatpush3.bf16.msra.mxu1 %v3685_v14 }
 0x2ec   :  { %3155 = vmatprep.subr.bf16.mxu1 %v3549_v16 }
 0x2ee   :  { %3144 = vmatmul.mubr.msk.bf16.vlgmr.msra.gmra.mrb[24].mxu1 %vm312_vm1, %v2720_v51 }
 0x2ef   :  { %3156 = vmatpush3.bf16.msra.mxu1 %v3687_v15  ;;  %3159 = vmatprep.mubr.msk.bf16.mxu1 %vm3550_vm0, %v3549_v16 }
 0x2f0   :  { %3157 = vmatprep.subr.bf16.mxu1 %v3549_v16 }
 0x2f3   :  { %3158 = vmatpush3.bf16.msra.mxu1 %v3685_v14 }
 0x2f4   :  { %3171 = vmatprep.subr.bf16.mxu1 %v3549_v16 }
 0x2f6   :  { %3160 = vmatmul.mubr.msk.bf16.vlgmr.msra.gmra.mrb[28].mxu1 %vm312_vm1, %v2729_v52 }
 0x2f7   :  { %3172 = vmatpush3.bf16.msra.mxu1 %v3687_v15  ;;  %3175 = vmatprep.mubr.msk.bf16.mxu1 %vm3550_vm0, %v3549_v16 }
 0x2f8   :  { %3173 = vmatprep.subr.bf16.mxu1 %v3549_v16 }
 0x2fb   :  { %3174 = vmatpush3.bf16.msra.mxu1 %v3685_v14 }
 0x2fc   :  { %3187 = vmatprep.subr.bf16.mxu1 %v3549_v16 }
 0x2fe   :  { %3176 = vmatmul.mubr.msk.bf16.vlgmr.msra.gmra.mrb[32].mxu1 %vm312_vm1, %v2738_v53 }
 0x2ff   :  { %3188 = vmatpush3.bf16.msra.mxu1 %v3687_v15  ;;  %3191 = vmatprep.mubr.msk.bf16.mxu1 %vm3550_vm0, %v3549_v16 }
 0x300   :  { %3189 = vmatprep.subr.bf16.mxu1 %v3549_v16 }
 0x303   :  { %3190 = vmatpush3.bf16.msra.mxu1 %v3685_v14 }
 0x304   :  { %3203 = vmatprep.subr.bf16.mxu1 %v3549_v16 }
 0x306   :  { %3192 = vmatmul.mubr.msk.bf16.vlgmr.msra.gmra.mrb[36].mxu1 %vm312_vm1, %v2747_v54 }
 0x307   :  { %3204 = vmatpush3.bf16.msra.mxu1 %v3687_v15  ;;  %3207 = vmatprep.mubr.msk.bf16.mxu1 %vm3550_vm0, %v3549_v16 }
 0x308   :  { %3205 = vmatprep.subr.bf16.mxu1 %v3549_v16 }
 0x30b   :  { %3206 = vmatpush3.bf16.msra.mxu1 %v3685_v14 }
 0x30c   :  { %3219 = vmatprep.subr.bf16.mxu1 %v3549_v16 }
 0x30e   :  { %3208 = vmatmul.mubr.msk.bf16.vlgmr.msra.gmra.mrb[40].mxu1 %vm312_vm1, %v2756_v55 }
 0x30f   :  { %3220 = vmatpush3.bf16.msra.mxu1 %v3687_v15  ;;  %3223 = vmatprep.mubr.msk.bf16.mxu1 %vm3550_vm0, %v3549_v16 }
 0x310   :  { %3221 = vmatprep.subr.bf16.mxu1 %v3549_v16 }
 0x313   :  { %3222 = vmatpush3.bf16.msra.mxu1 %v3685_v14 }
 0x314   :  { %3235 = vmatprep.subr.bf16.mxu1 %v3549_v16 }
 0x316   :  { %3224 = vmatmul.mubr.msk.bf16.vlgmr.msra.gmra.mrb[44].mxu1 %vm312_vm1, %v2765_v56 }
 0x317   :  { %3237 = vmatprep.mubr.msk.bf16.mxu1 %vm3550_vm0, %v3549_v16 }
 0x3b9   :  { %v622_v58 = vpop.f32.mrb[20].mxu1 }
 0x3ba   :  { %v3820_v59 = vadd.f32 %v622_v58, %v517_v42  ;;  %v3137_v60 = vpop.f32.mrb[21].mxu1 }
 0x3bb   :  { %v625_v61 = vpop.f32.mrb[22].mxu1 }
 0x3bc   :  { %v3138_v62 = vpop.f32.mrb[23].mxu1 }
 0x3c1   :  { %v668_v63 = vpop.f32.mrb[24].mxu1 }
 0x3c2   :  { %v674_v1 = vpack.c.bf16 %v668_v63, %v668_v63  ;;  %v3145_v2 = vpop.f32.mrb[25].mxu1 }
 0x3c3   :  { %v671_v3 = vpop.f32.mrb[26].mxu1 }
 0x3c4   :  { %v3146_v4 = vpop.f32.mrb[27].mxu1  ;;  %3152 = vmatmul.mubr.msk.bf16.vlgmr.msra.gmra.mrb[16].mxu0 %vm312_vm1, %v674_v1 }
 0x3c5   :  { %3164 = vmatpush3.bf16.msra.mxu0 %v3477_v0  ;;  %3167 = vmatprep.mubr.msk.bf16.mxu0 %vm3550_vm0, %v3549_v16  ;;  %v2774_v4 = vld [vmem:[%s4201_s5] ss:$0 sm:$0xff] }
 0x3c6   :  { %3165 = vmatprep.subr.bf16.mxu0 %v3549_v16 }
 0x3c9   :  { %v775_v6 = vpop.f32.mrb[28].mxu1  ;;  %3166 = vmatpush3.bf16.msra.mxu0 %v3478_v5 }
 0x3ca   :  { %v781_v8 = vpack.c.bf16 %v775_v6, %v775_v6  ;;  %v3161_v9 = vpop.f32.mrb[29].mxu1  ;;  %3179 = vmatprep.subr.bf16.mxu0 %v3549_v16 }
 0x3cb   :  { %v778_v10 = vpop.f32.mrb[30].mxu1 }
 0x3cc   :  { %v3162_v11 = vpop.f32.mrb[31].mxu1  ;;  %3168 = vmatmul.mubr.msk.bf16.vlgmr.msra.gmra.mrb[20].mxu0 %vm312_vm1, %v781_v8 }
 0x3cd   :  { %3180 = vmatpush3.bf16.msra.mxu0 %v3479_v7  ;;  %3183 = vmatprep.mubr.msk.bf16.mxu0 %vm3550_vm0, %v3549_v16 }
 0x3ce   :  { %3181 = vmatprep.subr.bf16.mxu0 %v3549_v16 }
 0x3d1   :  { %v882_v13 = vpop.f32.mrb[32].mxu1  ;;  %3182 = vmatpush3.bf16.msra.mxu0 %v3480_v12 }
 0x3d2   :  { %v888_v18 = vpack.c.bf16 %v882_v13, %v882_v13  ;;  %v3177_v19 = vpop.f32.mrb[33].mxu1  ;;  %3195 = vmatprep.subr.bf16.mxu0 %v3549_v16  ;;  %v1281_v13 = vld [vmem:[%s4202_s6] sm:$0xf] }
 0x3d3   :  { %v885_v20 = vpop.f32.mrb[34].mxu1  ;;  %v3488_v19 = vld [vmem:[%s4203_s7] sm:$0xff]  }
 0x3d4   :  { %v3178_v21 = vpop.f32.mrb[35].mxu1  ;;  %3184 = vmatmul.mubr.msk.bf16.vlgmr.msra.gmra.mrb[24].mxu0 %vm312_vm1, %v888_v18  ;;  %v3487_v18 = vld [vmem:[%s4203_s7 + $0x20] sm:$0xff]   ;;  %v3489_v20 = vld [vmem:[%s4203_s7 + $0x28] sm:$0xff]  }
 0x3d5   :  { %3196 = vmatpush3.bf16.msra.mxu0 %v3481_v17  ;;  %3199 = vmatprep.mubr.msk.bf16.mxu0 %vm3550_vm0, %v3549_v16  ;;  %v2776_v17 = vld [vmem:[%s4202_s6 + $0x4] sm:$0xf]  ;;  %v3490_v21 = vld [vmem:[%s4203_s7 + $0x8] sm:$0xff]  }
 0x3d6   :  { %3197 = vmatprep.subr.bf16.mxu0 %v3549_v16 }
 0x3d9   :  { %v989_v23 = vpop.f32.mrb[36].mxu1  ;;  %3198 = vmatpush3.bf16.msra.mxu0 %v3482_v22  ;;  %v3491_v22 = vld [vmem:[%s4203_s7 + $0x30] sm:$0xff]  }
 0x3da   :  { %v995_v25 = vpack.c.bf16 %v989_v23, %v989_v23  ;;  %v3193_v26 = vpop.f32.mrb[37].mxu1  ;;  %3211 = vmatprep.subr.bf16.mxu0 %v3549_v16  ;;  %v3492_v23 = vld [vmem:[%s4203_s7 + $0x10] sm:$0xff]  }
 0x3db   :  { %v992_v27 = vpop.f32.mrb[38].mxu1 }
 0x3dc   :  { %v3194_v28 = vpop.f32.mrb[39].mxu1  ;;  %3200 = vmatmul.mubr.msk.bf16.vlgmr.msra.gmra.mrb[28].mxu0 %vm312_vm1, %v995_v25  ;;  %v3494_v25 = vld [vmem:[%s4203_s7 + $0x18] sm:$0xff]  }
 0x3dd   :  { %3212 = vmatpush3.bf16.msra.mxu0 %v3483_v24  ;;  %3215 = vmatprep.mubr.msk.bf16.mxu0 %vm3550_vm0, %v3549_v16  ;;  %v3493_v24 = vld [vmem:[%s4203_s7 + $0x38] sm:$0xff]  }
 0x3de   :  { %3213 = vmatprep.subr.bf16.mxu0 %v3549_v16 }
 0x3e1   :  { %v1096_v30 = vpop.f32.mrb[40].mxu1  ;;  %3214 = vmatpush3.bf16.msra.mxu0 %v3484_v29 }
 0x3e2   :  { %v1102_v32 = vpack.c.bf16 %v1096_v30, %v1096_v30  ;;  %v3209_v33 = vpop.f32.mrb[41].mxu1  ;;  %3227 = vmatprep.subr.bf16.mxu0 %v3549_v16 }
 0x3e3   :  { %v1099_v34 = vpop.f32.mrb[42].mxu1 }
 0x3e4   :  { %v3210_v35 = vpop.f32.mrb[43].mxu1  ;;  %3216 = vmatmul.mubr.msk.bf16.vlgmr.msra.gmra.mrb[32].mxu0 %vm312_vm1, %v1102_v32  ;;  %v3495_v32 = vld [vmem:[%s4203_s7 + $0x40] sm:$0xff]  }
 0x3e5   :  { %3228 = vmatpush3.bf16.msra.mxu0 %v3485_v31  ;;  %3231 = vmatprep.mubr.msk.bf16.mxu0 %vm3550_vm0, %v3549_v16 }
 0x3e6   :  { %3229 = vmatprep.subr.bf16.mxu0 %v3549_v16 }
 0x3e9   :  { %v1203_v37 = vpop.f32.mrb[44].mxu1  ;;  %3230 = vmatpush3.bf16.msra.mxu0 %v3486_v36 }
 0x3ea   :  { %v1209_v38 = vpack.c.bf16 %v1203_v37, %v1203_v37  ;;  %v3225_v39 = vpop.f32.mrb[45].mxu1  ;;  %3241 = vmatprep.subr.bf16.mxu0 %v3549_v16  ;;  %v3496_v37 = vld [vmem:[%s4203_s7 + $0x48] sm:$0xff]  }
 0x3eb   :  { %v1206_v40 = vpop.f32.mrb[46].mxu1  ;;  %v2811_v39 = vld [vmem:[%s4202_s6 + $0xc] sm:$0xf] }
 0x3ec   :  { %v3226_v41 = vpop.f32.mrb[47].mxu1  ;;  %3232 = vmatmul.mubr.msk.bf16.vlgmr.msra.gmra.mrb[36].mxu0 %vm312_vm1, %v1209_v38  ;;  %v2796_v38 = vld [vmem:[%s4202_s6 + $0x8] sm:$0xf]  ;;  %v3497_v40 = vld [vmem:[%s4203_s7 + $0x50] sm:$0xff]  }
 0x3ed   :  { %3243 = vmatprep.mubr.msk.bf16.mxu0 %vm3550_vm0, %v3549_v16  ;;  %v3498_v41 = vld [vmem:[%s4203_s7 + $0x60] sm:$0xff]  }
 0x497   :  { %v729_v42 = vpop.f32.mrb[16].mxu0 }
 0x498   :  { %v735_v43 = vadd.f32 %v729_v42, %v3820_v59  ;;  %v3153_v44 = vpop.f32.mrb[17].mxu0  ;;  %v3499_v42 = vld [vmem:[%s4203_s7 + $0x58] sm:$0xff]  }
 0x499   :  { %v732_v45 = vpop.f32.mrb[18].mxu0  ;;  %v3501_v44 = vld [vmem:[%s4203_s7 + $0x70] sm:$0xff]  }
 0x49a   :  { %v3154_v46 = vpop.f32.mrb[19].mxu0  ;;  %v3502_v45 = vld [vmem:[%s4203_s7 + $0x78] sm:$0xff]  }
 0x49f   :  { %v836_v47 = vpop.f32.mrb[20].mxu0 }
 0x4a0   :  { %v842_v48 = vadd.f32 %v836_v47, %v735_v43  ;;  %v3169_v49 = vpop.f32.mrb[21].mxu0  ;;  %v3500_v43 = vld [vmem:[%s4203_s7 + $0x68] sm:$0xff]  }
 0x4a1   :  { %v839_v50 = vpop.f32.mrb[22].mxu0 }
 0x4a2   :  { %v3170_v51 = vpop.f32.mrb[23].mxu0 }
 0x4a7   :  { %v943_v52 = vpop.f32.mrb[24].mxu0 }
 0x4a8   :  { %v949_v53 = vadd.f32 %v943_v52, %v842_v48  ;;  %v3185_v54 = vpop.f32.mrb[25].mxu0 }
 0x4a9   :  { %v946_v55 = vpop.f32.mrb[26].mxu0 }
 0x4aa   :  { %v3186_v56 = vpop.f32.mrb[27].mxu0 }
 0x4af   :  { %v1050_v57 = vpop.f32.mrb[28].mxu0 }
 0x4b0   :  { %v1056_v58 = vadd.f32 %v1050_v57, %v949_v53  ;;  %v3201_v60 = vpop.f32.mrb[29].mxu0 }
 0x4b1   :  { %v1053_v61 = vpop.f32.mrb[30].mxu0 }
 0x4b2   :  { %v3202_v62 = vpop.f32.mrb[31].mxu0 }
 0x4b3   :  { %v2826_v62 = vld [vmem:[%s4202_s6 + $0x10] sm:$0xf] }
 0x4b7   :  { %v1157_v63 = vpop.f32.mrb[32].mxu0 }
 0x4b8   :  { %v1163_v59 = vadd.f32 %v1157_v63, %v1056_v58  ;;  %v3217_v0 = vpop.f32.mrb[33].mxu0 }
 0x4b9   :  { %v1160_v1 = vpop.f32.mrb[34].mxu0  ;;  %v3503_v0 = vld [vmem:[%s4203_s7 + $0x80] sm:$0xff]  }
 0x4ba   :  { %v3218_v2 = vpop.f32.mrb[35].mxu0 }
 0x4bf   :  { %v1264_v3 = vpop.f32.mrb[36].mxu0 }
 0x4c0   :  { %v1270_v5 = vadd.f32 %v1264_v3, %v1163_v59  ;;  %v3233_v6 = vpop.f32.mrb[37].mxu0  ;;  %v3504_v3 = vld [vmem:[%s4203_s7 + $0x88] sm:$0xff]  }
 0x4c1   :  { %v1267_v7 = vpop.f32.mrb[38].mxu0  ;;  %v3506_v6 = vld [vmem:[%s4203_s7 + $0xa0] sm:$0xff]  }
 0x4c2   :  { %v1278_v8 = vadd.f32 %v2774_v4, %v1270_v5  ;;  %v3234_v9 = vpop.f32.mrb[39].mxu0  ;;  %v2841_v4 = vld [vmem:[%s4202_s6 + $0x14] sm:$0xf]  ;;  %v3507_v7 = vld [vmem:[%s4203_s7 + $0x98] sm:$0xff]  }
 0x4c3   :  { %v3505_v5 = vld [vmem:[%s4203_s7 + $0x90] sm:$0xff]  }
 0x4c4   :  { %v1279_v10 = vmax.f32 %v1278_v8, 0.0  ;;  %v3508_v8 = vld [vmem:[%s4203_s7 + $0xa8] sm:$0xff]   ;;  %v3509_v9 = vld [vmem:[%s4203_s7 + $0xb0] sm:$0xff]  }
 0x4c6   :  { %v1280_v11 = vpack.c.bf16 %v1279_v10, %v1279_v10  ;;  %v3510_v10 = vld [vmem:[%s4203_s7 + $0xb8] sm:$0xff]  }
 0x4c8   :  { %v3884_v12 = vsel %vm1286_vm2, %v1280_v11, 0 }
 0x4c9   :  { %3236 = vmatpush3.bf16.msra.mxu1 %v3884_v12  ;;  %3242 = vmatpush3.bf16.msra.mxu0 %v3884_v12 }
 0x4ca   :  { %3247 = vmatprep.subr.bf16.mxu1 %v3549_v16  ;;  %3259 = vmatprep.subr.bf16.mxu0 %v3549_v16 }
 0x4cc   :  { %3238 = vmatmul.mubr.msk.bf16.vlgmr.msra.gmra.mrb[48].mxu1 %vm1282_vm3, %v1281_v13  ;;  %3244 = vmatmul.mubr.msk.bf16.vlgmr.msra.gmra.mrb[40].mxu0 %vm1282_vm3, %v2776_v17 }
 0x4cd   :  { %3248 = vmatpush3.bf16.msra.mxu1 %v3487_v18  ;;  %3260 = vmatpush3.bf16.msra.mxu0 %v3488_v19 }
 0x4ce   :  { %3249 = vmatprep.subr.bf16.mxu1 %v3549_v16  ;;  %3261 = vmatprep.subr.bf16.mxu0 %v3549_v16 }
 0x4cf   :  { %3255 = vmatprep.mubr.msk.bf16.mxu1 %vm3550_vm0, %v3549_v16  ;;  %3267 = vmatprep.mubr.msk.bf16.mxu0 %vm3550_vm0, %v3549_v16 }
 0x4d1   :  { %3250 = vmatpush3.bf16.msra.mxu1 %v3489_v20  ;;  %3262 = vmatpush3.bf16.msra.mxu0 %v3490_v21 }
 0x4d2   :  { %3251 = vmatprep.subr.bf16.mxu1 %v3549_v16  ;;  %3263 = vmatprep.subr.bf16.mxu0 %v3549_v16 }
 0x4d5   :  { %3252 = vmatpush3.bf16.msra.mxu1 %v3491_v22  ;;  %3264 = vmatpush3.bf16.msra.mxu0 %v3492_v23 }
 0x4d6   :  { %3253 = vmatprep.subr.bf16.mxu1 %v3549_v16  ;;  %3265 = vmatprep.subr.bf16.mxu0 %v3549_v16 }
 0x4d9   :  { %3254 = vmatpush3.bf16.msra.mxu1 %v3493_v24  ;;  %3266 = vmatpush3.bf16.msra.mxu0 %v3494_v25 }
 0x4da   :  { %3271 = vmatprep.subr.bf16.mxu1 %v3549_v16  ;;  %3277 = vmatprep.subr.bf16.mxu0 %v3549_v16 }
 0x59f   :  { %v1324_v26 = vpop.f32.mrb[48].mxu1  ;;  %v1378_v27 = vpop.f32.mrb[40].mxu0 }
 0x5a0   :  { %v1330_v28 = vpack.c.bf16 %v1324_v26, %v1324_v26  ;;  %v1384_v29 = vpack.c.bf16 %v1378_v27, %v1378_v27  ;;  %v3245_v30 = vpop.f32.mrb[41].mxu0  ;;  %v3239_v31 = vpop.f32.mrb[49].mxu1 }
 0x5a1   :  { %v1381_v33 = vpop.f32.mrb[42].mxu0  ;;  %v1327_v34 = vpop.f32.mrb[50].mxu1  ;;  %v2856_v31 = vld [vmem:[%s4202_s6 + $0x18] sm:$0xf] }
 0x5a2   :  { %v3246_v35 = vpop.f32.mrb[43].mxu0  ;;  %3256 = vmatmul.mubr.msk.bf16.vlgmr.msra.gmra.mrb[52].mxu1 %vm1418_vm4, %v1384_v29  ;;  %3268 = vmatmul.mubr.msk.bf16.vlgmr.msra.gmra.mrb[44].mxu0 %vm1418_vm4, %v1330_v28  ;;  %v3240_v36 = vpop.f32.mrb[51].mxu1  ;;  %v3511_v34 = vld [vmem:[%s4203_s7 + $0xc0] sm:$0xff]  }
 0x5a3   :  { %3272 = vmatpush3.bf16.msra.mxu1 %v3884_v12  ;;  %3273 = vmatprep.mubr.msk.bf16.mxu1 %vm3550_vm0, %v3549_v16 }
 0x5a4   :  { %3289 = vmatprep.subr.bf16.mxu1 %v3549_v16  ;;  %3278 = vmatpush3.bf16.msra.mxu0 %v3495_v32 }
 0x5a5   :  { %3279 = vmatprep.subr.bf16.mxu0 %v3549_v16  ;;  %3285 = vmatprep.mubr.msk.bf16.mxu0 %vm3550_vm0, %v3549_v16 }
 0x5a8   :  { %3280 = vmatpush3.bf16.msra.mxu0 %v3496_v37  ;;  %v3512_v37 = vld [vmem:[%s4203_s7 + $0xc8] sm:$0xff]  }
 0x5a9   :  { %3281 = vmatprep.subr.bf16.mxu0 %v3549_v16 }
 0x5aa   :  { %3274 = vmatmul.mubr.msk.bf16.vlgmr.msra.gmra.mrb[56].mxu1 %vm1282_vm3, %v2796_v38  ;;  %v2871_v38 = vld [vmem:[%s4202_s6 + $0x1c] sm:$0xf] }
 0x5ab   :  { %3290 = vmatpush3.bf16.msra.mxu1 %v3884_v12  ;;  %3291 = vmatprep.mubr.msk.bf16.mxu1 %vm3550_vm0, %v3549_v16 }
 0x5ac   :  { %3295 = vmatprep.subr.bf16.mxu1 %v3549_v16  ;;  %3282 = vmatpush3.bf16.msra.mxu0 %v3497_v40  ;;  %v3514_v40 = vld [vmem:[%s4203_s7 + $0xe0] sm:$0xff]  }
 0x5ad   :  { %3283 = vmatprep.subr.bf16.mxu0 %v3549_v16 }
 0x5b0   :  { %3284 = vmatpush3.bf16.msra.mxu0 %v3499_v42  ;;  %v3516_v42 = vld [vmem:[%s4203_s7 + $0xe8] sm:$0xff]  }
 0x5b1   :  { %3307 = vmatprep.subr.bf16.mxu0 %v3549_v16 }
 0x5b2   :  { %3292 = vmatmul.mubr.msk.bf16.vlgmr.msra.gmra.mrb[60].mxu1 %vm1282_vm3, %v2811_v39  ;;  %v3513_v39 = vld [vmem:[%s4203_s7 + $0xd0] sm:$0xff]  }
 0x5b3   :  { %3303 = vmatprep.mubr.msk.bf16.mxu1 %vm3550_vm0, %v3549_v16  ;;  %3296 = vmatpush3.bf16.msra.mxu1 %v3498_v41  ;;  %v3515_v41 = vld [vmem:[%s4203_s7 + $0xd8] sm:$0xff]  }
 0x5b4   :  { %3297 = vmatprep.subr.bf16.mxu1 %v3549_v16 }
 0x5b7   :  { %3298 = vmatpush3.bf16.msra.mxu1 %v3500_v43  ;;  %v3517_v43 = vld [vmem:[%s4203_s7 + $0xf0] sm:$0xff]  }
 0x5b8   :  { %3299 = vmatprep.subr.bf16.mxu1 %v3549_v16 }
 0x5bb   :  { %3300 = vmatpush3.bf16.msra.mxu1 %v3501_v44  ;;  %v3518_v44 = vld [vmem:[%s4203_s7 + $0xf8] sm:$0xff]  }
 0x5bc   :  { %3301 = vmatprep.subr.bf16.mxu1 %v3549_v16 }
 0x5bf   :  { %3302 = vmatpush3.bf16.msra.mxu1 %v3502_v45 }
 0x5c0   :  { %3325 = vmatprep.subr.bf16.mxu1 %v3549_v16 }
 0x675   :  { %v1456_v46 = vpop.f32.mrb[52].mxu1  ;;  %v1523_v47 = vpop.f32.mrb[44].mxu0 }
 0x676   :  { %v1524_v48 = vadd.f32 %v1523_v47, %v1456_v46  ;;  %v3257_v49 = vpop.f32.mrb[53].mxu1  ;;  %v3269_v50 = vpop.f32.mrb[45].mxu0 }
 0x677   :  { %v1459_v51 = vpop.f32.mrb[54].mxu1  ;;  %v1526_v52 = vpop.f32.mrb[46].mxu0 }
 0x678   :  { %v3258_v53 = vpop.f32.mrb[55].mxu1  ;;  %v3270_v54 = vpop.f32.mrb[47].mxu0 }
 0x67d   :  { %v1568_v55 = vpop.f32.mrb[56].mxu1 }
 0x67e   :  { %v1574_v56 = vpack.c.bf16 %v1568_v55, %v1568_v55  ;;  %v3275_v57 = vpop.f32.mrb[57].mxu1 }
 0x67f   :  { %v1571_v58 = vpop.f32.mrb[58].mxu1 }
 0x680   :  { %v3276_v60 = vpop.f32.mrb[59].mxu1  ;;  %3286 = vmatmul.mubr.msk.bf16.vlgmr.msra.gmra.mrb[48].mxu0 %vm1418_vm4, %v1574_v56 }
 0x681   :  { %3308 = vmatpush3.bf16.msra.mxu0 %v3884_v12  ;;  %3309 = vmatprep.mubr.msk.bf16.mxu0 %vm3550_vm0, %v3549_v16 }
 0x682   :  { %3313 = vmatprep.subr.bf16.mxu0 %v3549_v16 }
 0x685   :  { %v1691_v61 = vpop.f32.mrb[60].mxu1 }
 0x686   :  { %v1697_v63 = vpack.c.bf16 %v1691_v61, %v1691_v61  ;;  %v3293_v59 = vpop.f32.mrb[61].mxu1 }
 0x687   :  { %v1694_v1 = vpop.f32.mrb[62].mxu1 }
 0x688   :  { %v3294_v2 = vpop.f32.mrb[63].mxu1  ;;  %3304 = vmatmul.mubr.msk.bf16.vlgmr.msra.gmra.mrb[64].mxu1 %vm1418_vm4, %v1697_v63  ;;  %3310 = vmatmul.mubr.msk.bf16.vlgmr.msra.gmra.mrb[52].mxu0 %vm1282_vm3, %v2826_v62  ;;  %v2886_v62 = vld [vmem:[%s4202_s6 + $0x20] sm:$0xf] }
 0x689   :  { %3326 = vmatpush3.bf16.msra.mxu1 %v3884_v12  ;;  %3327 = vmatprep.mubr.msk.bf16.mxu1 %vm3550_vm0, %v3549_v16 }
 0x68a   :  { %3314 = vmatpush3.bf16.msra.mxu0 %v3503_v0  ;;  %3331 = vmatprep.subr.bf16.mxu1 %v3549_v16  ;;  %v3519_v0 = vld [vmem:[%s4203_s7 + $0x100] sm:$0xff]  }
 0x68b   :  { %3315 = vmatprep.subr.bf16.mxu0 %v3549_v16  ;;  %3321 = vmatprep.mubr.msk.bf16.mxu0 %vm3550_vm0, %v3549_v16 }
 0x68e   :  { %3316 = vmatpush3.bf16.msra.mxu0 %v3504_v3  ;;  %v3522_v3 = vld [vmem:[%s4203_s7 + $0x118] sm:$0xff]  }
 0x68f   :  { %3317 = vmatprep.subr.bf16.mxu0 %v3549_v16 }
 0x690   :  { %3328 = vmatmul.mubr.msk.bf16.vlgmr.msra.gmra.mrb[68].mxu1 %vm1282_vm3, %v2841_v4  ;;  %v3523_v4 = vld [vmem:[%s4205_s9] sm:$0xff]  }
 0x691   :  { %3339 = vmatprep.mubr.msk.bf16.mxu1 %vm3550_vm0, %v3549_v16  ;;  %3332 = vmatpush3.bf16.msra.mxu1 %v3506_v6 }
 0x692   :  { %3318 = vmatpush3.bf16.msra.mxu0 %v3505_v5  ;;  %3333 = vmatprep.subr.bf16.mxu1 %v3549_v16  ;;  %v3524_v5 = vld [vmem:[%s4205_s9 + $0x8] sm:$0xff]  }
 0x693   :  { %3319 = vmatprep.subr.bf16.mxu0 %v3549_v16 }
 0x695   :  { %3334 = vmatpush3.bf16.msra.mxu1 %v3508_v8 }
 0x696   :  { %3320 = vmatpush3.bf16.msra.mxu0 %v3507_v7  ;;  %3335 = vmatprep.subr.bf16.mxu1 %v3549_v16 }
 0x697   :  { %3343 = vmatprep.subr.bf16.mxu0 %v3549_v16 }
 0x699   :  { %3336 = vmatpush3.bf16.msra.mxu1 %v3509_v9 }
 0x69a   :  { %3337 = vmatprep.subr.bf16.mxu1 %v3549_v16 }
 0x69d   :  { %3338 = vmatpush3.bf16.msra.mxu1 %v3510_v10 }
 0x69e   :  { %3361 = vmatprep.subr.bf16.mxu1 %v3549_v16 }
 0x753   :  { %v1645_v11 = vpop.f32.mrb[48].mxu0 }
 0x754   :  { %v1651_v13 = vadd.f32 %v1645_v11, %v1524_v48  ;;  %v3287_v17 = vpop.f32.mrb[49].mxu0 }
 0x755   :  { %v1648_v18 = vpop.f32.mrb[50].mxu0 }
 0x756   :  { %v3288_v19 = vpop.f32.mrb[51].mxu0 }
 0x75b   :  { %v1768_v20 = vpop.f32.mrb[64].mxu1  ;;  %v1814_v21 = vpop.f32.mrb[52].mxu0 }
 0x75c   :  { %v1774_v22 = vadd.f32 %v1768_v20, %v1651_v13  ;;  %v1820_v23 = vpack.c.bf16 %v1814_v21, %v1814_v21  ;;  %v3305_v24 = vpop.f32.mrb[65].mxu1  ;;  %v3311_v25 = vpop.f32.mrb[53].mxu0 }
 0x75d   :  { %v1771_v26 = vpop.f32.mrb[66].mxu1  ;;  %v1817_v27 = vpop.f32.mrb[54].mxu0 }
 0x75e   :  { %v3306_v28 = vpop.f32.mrb[67].mxu1  ;;  %3322 = vmatmul.mubr.msk.bf16.vlgmr.msra.gmra.mrb[56].mxu0 %vm1418_vm4, %v1820_v23  ;;  %v3312_v29 = vpop.f32.mrb[55].mxu0 }
 0x75f   :  { %3344 = vmatpush3.bf16.msra.mxu0 %v3884_v12  ;;  %3345 = vmatprep.mubr.msk.bf16.mxu0 %vm3550_vm0, %v3549_v16 }
 0x760   :  { %3349 = vmatprep.subr.bf16.mxu0 %v3549_v16 }
 0x763   :  { %v1937_v30 = vpop.f32.mrb[68].mxu1 }
 0x764   :  { %v1943_v32 = vpack.c.bf16 %v1937_v30, %v1937_v30  ;;  %v3329_v33 = vpop.f32.mrb[69].mxu1  ;;  %v2578_v30 = vld [vmem:[%s4208_s12] sm:$0xff] }
 0x765   :  { %v1940_v35 = vpop.f32.mrb[70].mxu1  ;;  %v3551_v33 = vmov 0.0|0.0  }
 0x766   :  { %v3330_v36 = vpop.f32.mrb[71].mxu1  ;;  %3340 = vmatmul.mubr.msk.bf16.vlgmr.msra.gmra.mrb[72].mxu1 %vm1418_vm4, %v1943_v32  ;;  %3346 = vmatmul.mubr.msk.bf16.vlgmr.msra.gmra.mrb[60].mxu0 %vm1282_vm3, %v2856_v31  ;;  %v2579_v31 = vld [vmem:[%s4208_s12 + $0x8] sm:$0xff]  ;;  %v2580_v32 = vld [vmem:[%s4208_s12 + $0x10] sm:$0xff]  ;;  %v2581_v35 = vld [vmem:[%s4208_s12 + $0x18] sm:$0xff] }
 0x767   :  { %3362 = vmatpush3.bf16.msra.mxu1 %v3884_v12  ;;  %3363 = vmatprep.mubr.msk.bf16.mxu1 %vm3550_vm0, %v3549_v16  ;;  %v2582_v36 = vld [vmem:[%s4208_s12 + $0x20] sm:$0xff] }
 0x768   :  { %3350 = vmatpush3.bf16.msra.mxu0 %v3511_v34  ;;  %3367 = vmatprep.subr.bf16.mxu1 %v3549_v16  ;;  %v3438_v34 = vpack.c.bf16 %v2579_v31, %v2578_v30 }
 0x769   :  { %3351 = vmatprep.subr.bf16.mxu0 %v3549_v16  ;;  %3357 = vmatprep.mubr.msk.bf16.mxu0 %vm3550_vm0, %v3549_v16 }
 0x76c   :  { %3352 = vmatpush3.bf16.msra.mxu0 %v3512_v37  ;;  %v2583_v37 = vld [vmem:[%s4208_s12 + $0x28] sm:$0xff] }
 0x76d   :  { %3353 = vmatprep.subr.bf16.mxu0 %v3549_v16 }
 0x76e   :  { %3364 = vmatmul.mubr.msk.bf16.vlgmr.msra.gmra.mrb[76].mxu1 %vm1282_vm3, %v2871_v38  ;;  %v3444_v38 = vpack.c.bf16 %v2583_v37, %v2582_v36 }
 0x76f   :  { %3375 = vmatprep.mubr.msk.bf16.mxu1 %vm3550_vm0, %v3549_v16  ;;  %3368 = vmatpush3.bf16.msra.mxu1 %v3514_v40  ;;  %v2585_v40 = vld [vmem:[%s4208_s12 + $0x38] sm:$0xff] }
 0x770   :  { %3354 = vmatpush3.bf16.msra.mxu0 %v3513_v39  ;;  %3369 = vmatprep.subr.bf16.mxu1 %v3549_v16  ;;  %v2584_v39 = vld [vmem:[%s4208_s12 + $0x30] sm:$0xff] }
 0x771   :  { %3355 = vmatprep.subr.bf16.mxu0 %v3549_v16 }
 0x773   :  { %3370 = vmatpush3.bf16.msra.mxu1 %v3516_v42 }
 0x774   :  { %3356 = vmatpush3.bf16.msra.mxu0 %v3515_v41  ;;  %3371 = vmatprep.subr.bf16.mxu1 %v3549_v16  ;;  %v3447_v41 = vpack.c.bf16 %v2585_v40, %v2584_v39 }
 0x775   :  { %3379 = vmatprep.subr.bf16.mxu0 %v3549_v16 }
 0x777   :  { %3372 = vmatpush3.bf16.msra.mxu1 %v3517_v43 }
 0x778   :  { %3373 = vmatprep.subr.bf16.mxu1 %v3549_v16 }
 0x77b   :  { %3374 = vmatpush3.bf16.msra.mxu1 %v3518_v44 }
 0x77c   :  { %3397 = vmatprep.subr.bf16.mxu1 %v3549_v16 }
 0x831   :  { %v1891_v45 = vpop.f32.mrb[56].mxu0 }
 0x832   :  { %v1897_v46 = vadd.f32 %v1891_v45, %v1774_v22  ;;  %v3323_v47 = vpop.f32.mrb[57].mxu0 }
 0x833   :  { %v1894_v48 = vpop.f32.mrb[58].mxu0 }
 0x834   :  { %v3324_v49 = vpop.f32.mrb[59].mxu0  ;;  %v2905_v48 = vld [vmem:[%s4206_s10] ss:$0 sm:$0xff]  ;;  %s3552_s10 = smov [#allocation2]  }
 0x835   :  { %s2673_s27 = sshll.u32 %s3552_s10, 4  ;;  %s2674_s27 = int_to_ptr.vmem [resolvable:$true] %s2673_s27 }
 0x836   :  { %s3525_s5 = scalar_lea.vmem %s2674_s27, 32  ;;  %p3530_p1 = scmp.lt.s32.totalorder %s2674_s27, %s2674_s27 }
 0x837   :  { %p3526_p0 = scmp.ne.s32.totalorder %s2674_s27, %s3525_s5  ;;  %p3531_p2 = scmp.lt.s32.totalorder %s3525_s5, %s3525_s5 }
 0x839   :  { %v2014_v50 = vpop.f32.mrb[72].mxu1  ;;  %v2060_v51 = vpop.f32.mrb[60].mxu0  ;;  %p3532_p3 = por %p3531_p2, %p3530_p1 }
 0x83a   :  { %v2020_v52 = vadd.f32 %v2014_v50, %v1897_v46  ;;  %v2066_v53 = vpack.c.bf16 %v2060_v51, %v2060_v51  ;;  %v3341_v54 = vpop.f32.mrb[73].mxu1  ;;  %v3347_v55 = vpop.f32.mrb[61].mxu0 }
 0x83b   :  { %v2017_v56 = vpop.f32.mrb[74].mxu1  ;;  %v2063_v57 = vpop.f32.mrb[62].mxu0  ;;  %v2504_v55 = vld [vmem:[%s4207_s11] sm:$0x3]  ;;  %p3533_p4 = pnand %p3532_p3, %p3526_p0 }
 0x83c   :  { %v3342_v58 = vpop.f32.mrb[75].mxu1  ;;  %3358 = vmatmul.mubr.msk.bf16.vlgmr.msra.gmra.mrb[64].mxu0 %vm1418_vm4, %v2066_v53  ;;  %v3348_v60 = vpop.f32.mrb[63].mxu0 }
 0x83d   :  { %3380 = vmatpush3.bf16.msra.mxu0 %v3884_v12  ;;  %3381 = vmatprep.mubr.msk.bf16.mxu0 %vm3550_vm0, %v3549_v16  ;;  %v2390_v12 = vld [vmem:[%s4204_s8] sm:$0xf] }
 0x83e   :  { %3385 = vmatprep.subr.bf16.mxu0 %v3549_v16  ;;  %v2907_v58 = vld [vmem:[%s4209_s13] ss:$0 sm:$0xff] }
 0x841   :  { %v2183_v61 = vpop.f32.mrb[76].mxu1 }
 0x842   :  { %v2189_v63 = vpack.c.bf16 %v2183_v61, %v2183_v61  ;;  %v3365_v59 = vpop.f32.mrb[77].mxu1 }
 0x843   :  { %v2186_v1 = vpop.f32.mrb[78].mxu1 }
 0x844   :  { %v3366_v2 = vpop.f32.mrb[79].mxu1  ;;  %3376 = vmatmul.mubr.msk.bf16.vlgmr.msra.gmra.mrb[80].mxu1 %vm1418_vm4, %v2189_v63  ;;  %3382 = vmatmul.mubr.msk.bf16.vlgmr.msra.gmra.mrb[68].mxu0 %vm1282_vm3, %v2886_v62 }
 0x845   :  { %3398 = vmatpush3.bf16.msra.mxu1 %v3687_v15  ;;  %3401 = vmatprep.mubr.msk.bf16.mxu1 %vm3550_vm0, %v3549_v16  ;;  %v3520_v15 = vld [vmem:[%s4203_s7 + $0x108] sm:$0xff]  }
 0x846   :  { %3399 = vmatprep.subr.bf16.mxu1 %v3549_v16  ;;  %3386 = vmatpush3.bf16.msra.mxu0 %v3519_v0 }
 0x847   :  { %3387 = vmatprep.subr.bf16.mxu0 %v3549_v16  ;;  %3393 = vmatprep.mubr.msk.bf16.mxu0 %vm3550_vm0, %v3549_v16 }
 0x849   :  { %3400 = vmatpush3.bf16.msra.mxu1 %v3685_v14  ;;  %v3521_v14 = vld [vmem:[%s4203_s7 + $0x110] sm:$0xff]  }
 0x84a   :  { %3405 = vmatprep.subr.bf16.mxu1 %v3549_v16  ;;  %3388 = vmatpush3.bf16.msra.mxu0 %v3520_v15 }
 0x84b   :  { %3389 = vmatprep.subr.bf16.mxu0 %v3549_v16 }
 0x84c   :  { %3402 = vmatmul.mubr.msk.bf16.vlgmr.msra.gmra.mrb[84].mxu1 %vm312_vm1, %v2390_v12 }
 0x84d   :  { %3409 = vmatprep.mubr.msk.bf16.mxu1 %vm3550_vm0, %v3549_v16  ;;  %3406 = vmatpush3.bf16.msra.mxu1 %v3523_v4 }
 0x84e   :  { %3390 = vmatpush3.bf16.msra.mxu0 %v3521_v14  ;;  %3407 = vmatprep.subr.bf16.mxu1 %v3549_v16 }
 0x84f   :  { %3391 = vmatprep.subr.bf16.mxu0 %v3549_v16 }
 0x851   :  { %3408 = vmatpush3.bf16.msra.mxu1 %v3524_v5 }
 0x852   :  { %3392 = vmatpush3.bf16.msra.mxu0 %v3522_v3  ;;  %3437 = vmatprep.subr.bf16.mxu1 %v3551_v33 }
 0x853   :  { %3413 = vmatprep.subr.mxu0 %v3549_v16 }
 0x90f   :  { %v2137_v6 = vpop.f32.mrb[64].mxu0 }
 0x910   :  { %v2143_v7 = vadd.f32 %v2137_v6, %v2020_v52  ;;  %v3359_v8 = vpop.f32.mrb[65].mxu0 }
 0x911   :  { %v2140_v9 = vpop.f32.mrb[66].mxu0 }
 0x912   :  { %v3360_v10 = vpop.f32.mrb[67].mxu0 }
 0x917   :  { %v2260_v11 = vpop.f32.mrb[80].mxu1  ;;  %v2306_v13 = vpop.f32.mrb[68].mxu0 }
 0x918   :  { %v2266_v17 = vadd.f32 %v2260_v11, %v2143_v7  ;;  %v2312_v18 = vpack.c.bf16 %v2306_v13, %v2306_v13  ;;  %v3377_v19 = vpop.f32.mrb[81].mxu1  ;;  %v3383_v20 = vpop.f32.mrb[69].mxu0 }
 0x919   :  { %v2263_v21 = vpop.f32.mrb[82].mxu1  ;;  %v2309_v22 = vpop.f32.mrb[70].mxu0 }
 0x91a   :  { %v3378_v23 = vpop.f32.mrb[83].mxu1  ;;  %3394 = vmatmul.mubr.msk.bf16.vlgmr.msra.gmra.mrb[72].mxu0 %vm1418_vm4, %v2312_v18  ;;  %v3384_v24 = vpop.f32.mrb[71].mxu0 }
 0x91b   :  { %3415 = vmatprep.mubr.msk.f32.mxu0 %vm3550_vm0, %v3549_v16 }
 0x91f   :  { %v2428_v25 = vpop.f32.mrb[84].mxu1 }
 0x920   :  { %v2434_v26 = vpack.c.bf16 %v2428_v25, %v2428_v25  ;;  %v3403_v27 = vpop.f32.mrb[85].mxu1 }
 0x921   :  { %v2431_v28 = vpop.f32.mrb[86].mxu1 }
 0x922   :  { %v3404_v29 = vpop.f32.mrb[87].mxu1  ;;  %3410 = vmatmul.mubr.msk.bf16.vlgmr.msra.gmra.mrb[88].mxu1 %vm312_vm1, %v2434_v26 }
 0x923   :  { %3434 = vmatprep.mubr.msk.f32.mxu1 %vm3550_vm0, %v3549_v16  ;;  %3439 = vmatpush3.bf16.msra.mxu1 %v3438_v34  ;;  %v3441_v16 = vpack.c.bf16 %v2581_v35, %v2580_v32 }
 0x924   :  { %3440 = vmatprep.subr.bf16.mxu1 %v3551_v33 }
 0x927   :  { %3442 = vmatpush3.bf16.msra.mxu1 %v3441_v16 }
 0x928   :  { %3443 = vmatprep.subr.bf16.mxu1 %v3551_v33 }
 0x92b   :  { %3445 = vmatpush3.bf16.msra.mxu1 %v3444_v38 }
 0x92c   :  { %3446 = vmatprep.subr.bf16.mxu1 %v3551_v33 }
 0x92f   :  { %3448 = vmatpush3.bf16.msra.mxu1 %v3447_v41 }
 0x9ed   :  { %v2383_v42 = vpop.f32.mrb[72].mxu0 }
 0x9ee   :  { %v2389_v43 = vadd.f32 %v2383_v42, %v2266_v17  ;;  %v3395_v44 = vpop.f32.mrb[73].mxu0 }
 0x9ef   :  { %v2386_v45 = vpop.f32.mrb[74].mxu0 }
 0x9f0   :  { %v3396_v46 = vpop.f32.mrb[75].mxu0 }
 0x9f5   :  { %v2488_v47 = vpop.f32.mrb[88].mxu1 }
 0x9f6   :  { %v2494_v49 = vadd.f32 %v2488_v47, %v2389_v43  ;;  %v3411_v50 = vpop.f32.mrb[89].mxu1 }
 0x9f7   :  { %v2491_v51 = vpop.f32.mrb[90].mxu1 }
 0x9f8   :  { %v2502_v52 = vadd.f32 %v2905_v48, %v2494_v49  ;;  %v3412_v53 = vpop.f32.mrb[91].mxu1 }
 0x9fa   :  { %v2503_v54 = vmax.f32 %v2502_v52, 0.0 }
 0x9fc   :  { %3414 = vmatpush3.msra.mxu0 %v2503_v54 }
 0x9fd   :  { %3416 = vmatmul.mubr.msk.f32.vlgmr.msra.gmra.mrb[76].mxu0 %vm1282_vm3, %v2504_v55 }
 0xad0   :  { %v2574_v56 = vpop.f32.mrb[76].mxu0 }
 0xad1   :  { %v3417_v57 = vpop.f32.mrb[77].mxu0  ;;  %3435 = vmatmul.mubr.msk.f32.vlgmr.msra.gmra.mrb[92].mxu1 %vm1418_vm4, %v2574_v56 }
 0xba4   :  { %v2662_v60 = vpop.f32.mrb[92].mxu1 }
 0xba5   :  { %v2663_v61 = vadd.f32 %v2907_v58, %v2662_v60  ;;  %v3436_v62 = vpop.f32.mrb[93].mxu1 }
 0xba7   :  { %2666 = vst [vmem:[#allocation2] sm:$0x3] %v2663_v61 }
 0xba8   :  { %3536 = shalt.err (!%p3533_p4)
}
 0xba9   :  { %s3537_s29 = scalar_lea.hbm %s4210_s14, 32 }
 0xbaa   :  { %p3538_p5 = scmp.ne.s32.totalorder %s4210_s14, %s3537_s29  ;;  %p3541_p6 = scmp.lt.u32.totalorder %s3537_s29, %s4210_s14 }
 0xbac   :  { %p3543_p7 = pnand %p3541_p6, %p3538_p5 }
 0xbae   :  { %3546 = shalt.err (!%p3543_p7)
}
 0xbaf   :  { %2676 = dma.vmem_to_hbm [thread:$0]  %s2674_s27, 32, %s4210_s14, [#allocation3]  }
 0xbb0   :  { %3547 = dma.done.wait [#allocation3], 32  }
 0xbb1   :  { %3548 = vsyncadd [#allocation3], 4294967264 }
 0xbb2   :  { %2680 = vsyncpa [#allocation3], 1 }

</bundles_post_ra>
